<compile_context>
chip_gen: v7x
topology: tpu7x:2x2x1
jax: 0.10.0
libtpu: 0.0.40
codegen_flags: <defaults>
</compile_context>

<pallas_src>
import functools
import numpy as np
import jax
import jax.numpy as jnp
from jax.experimental import pallas as pl
from jax.experimental.pallas import tpu as pltpu


def _round_up(x, m):
    return ((x + m - 1) // m) * m


# -----------------------------------------------------------------------------
# Pallas kernel: one decode step = GRU cell + vocab-tiled output projection
# with online log-sum-exp and fused log-softmax normalization.
# -----------------------------------------------------------------------------
def _decode_step_kernel(x_ref, h_ref, wih_ref, whh_ref, bih_ref, bhh_ref,
                        wout_ref, bout_ref,
                        logp_ref, hnew_ref,
                        m_sc, l_sc, *, HP, TV):
    j = pl.program_id(0)

    @pl.when(j == 0)
    def _():
        # GRU cell (PyTorch GRUCell semantics), computed once per step.
        gi = jnp.dot(x_ref[...], wih_ref[...],
                     preferred_element_type=jnp.float32) + bih_ref[...]      # [BKP, 3HP]
        h = h_ref[...]                                                       # [BKP, HP] f32
        gh = jnp.dot(h.astype(jnp.bfloat16), whh_ref[...],
                     preferred_element_type=jnp.float32) + bhh_ref[...]      # [BKP, 3HP]
        r = jax.nn.sigmoid(gi[:, 0:HP] + gh[:, 0:HP])
        z = jax.nn.sigmoid(gi[:, HP:2 * HP] + gh[:, HP:2 * HP])
        n = jnp.tanh(gi[:, 2 * HP:3 * HP] + r * gh[:, 2 * HP:3 * HP])
        hnew_ref[...] = (1.0 - z) * n + z * h                                # [BKP, HP]
        m_sc[...] = jnp.full_like(m_sc, -jnp.inf)
        l_sc[...] = jnp.zeros_like(l_sc)

    # Output projection for this vocab tile (streamed w_out) + online LSE.
    # h_new is read from the VMEM-resident output (constant index map).
    h_new = hnew_ref[...]
    logits = jnp.dot(h_new.astype(jnp.bfloat16), wout_ref[...],
                     preferred_element_type=jnp.float32) + bout_ref[...]     # [BKP, TV]
    col = pl.multiple_of(j * TV, TV)
    logp_ref[:, pl.ds(col, TV)] = logits                                     # lane-dense, aligned

    m_old = m_sc[...]
    m_new = jnp.maximum(m_old, jnp.max(logits, axis=-1, keepdims=True))
    l_sc[...] = (l_sc[...] * jnp.exp(m_old - m_new)
                 + jnp.sum(jnp.exp(logits - m_new), axis=-1, keepdims=True))
    m_sc[...] = m_new

    @pl.when(j == pl.num_programs(0) - 1)
    def _():
        # Fused log-softmax: normalize the resident buffer in place.
        lse = m_sc[...] + jnp.log(l_sc[...])
        logp_ref[...] = logp_ref[...] - lse


def _vmem_limit_bytes(BKP, EP, HP, VP, TV):
    # Conservative (double-buffered) footprint estimate + headroom.
    const_in = 2 * (BKP * EP * 2 + BKP * HP * 4
                    + EP * 3 * HP * 2 + HP * 3 * HP * 2 + 2 * (3 * HP) * 4)
    streamed = 3 * (HP * TV * 2 + TV * 4)
    outs = 2 * (BKP * VP * 4 + BKP * HP * 4)
    scratch = 2 * BKP * 128 * 4
    est = const_in + streamed + outs + scratch
    return int(min(max(est + est // 2 + (4 << 20), 32 << 20), 100 << 20))


def make_step_call(BKP, EP, HP, VP, TV, *, use_pipeline_mode=True):
    n_vocab_tiles = VP // TV
    kernel = functools.partial(_decode_step_kernel, HP=HP, TV=TV)

    def const_spec(shape):
        if use_pipeline_mode:
            # Block index never changes across the vocab axis -> single buffer.
            return pl.BlockSpec(shape, lambda j: (0, 0),
                                pipeline_mode=pl.Buffered(1))
        return pl.BlockSpec(shape, lambda j: (0, 0))

    if use_pipeline_mode and n_vocab_tiles >= 3:
        wout_spec = pl.BlockSpec((HP, TV), lambda j: (0, j),
                                 pipeline_mode=pl.Buffered(3))
        bout_spec = pl.BlockSpec((1, TV), lambda j: (0, j),
                                 pipeline_mode=pl.Buffered(3))
    else:
        wout_spec = pl.BlockSpec((HP, TV), lambda j: (0, j))
        bout_spec = pl.BlockSpec((1, TV), lambda j: (0, j))

    grid_spec = pltpu.PrefetchScalarGridSpec(
        num_scalar_prefetch=0,
        grid=(n_vocab_tiles,),
        in_specs=[
            const_spec((BKP, EP)),          # x        (bf16)
            const_spec((BKP, HP)),          # h        (f32)
            const_spec((EP, 3 * HP)),       # w_ih     (bf16)
            const_spec((HP, 3 * HP)),       # w_hh     (bf16)
            const_spec((1, 3 * HP)),        # b_ih     (f32)
            const_spec((1, 3 * HP)),        # b_hh     (f32)
            wout_spec,                      # w_out tile (bf16, streamed)
            bout_spec,                      # b_out tile (f32, streamed)
        ],
        out_specs=(
            pl.BlockSpec((BKP, VP), lambda j: (0, 0)),   # logp (resident accumulator)
            pl.BlockSpec((BKP, HP), lambda j: (0, 0)),   # new hidden (resident)
        ),
        scratch_shapes=[
            pltpu.VMEM((BKP, 1), jnp.float32),           # running max
            pltpu.VMEM((BKP, 1), jnp.float32),           # running sum
        ],
    )

    return pl.pallas_call(
        kernel,
        grid_spec=grid_spec,
        out_shape=(
            jax.ShapeDtypeStruct((BKP, VP), jnp.float32),
            jax.ShapeDtypeStruct((BKP, HP), jnp.float32),
        ),
        compiler_params=pltpu.CompilerParams(
            dimension_semantics=("arbitrary",),
            vmem_limit_bytes=_vmem_limit_bytes(BKP, EP, HP, VP, TV)),
    )


# -----------------------------------------------------------------------------
# TopKDecoder forward (beam search) — mirrors the PyTorch module.
# -----------------------------------------------------------------------------
class TopKDecoderPallas:
    def __init__(self, params, k, hidden_size, vocab_size, embed_size,
                 max_length, sos_id, eos_id, vocab_tile=1024,
                 vmem_budget_bytes=40 << 20):
        self.k = k
        self.hidden_size = hidden_size
        self.V = vocab_size
        self.E = embed_size
        self.max_length = max_length
        self.SOS = sos_id
        self.EOS = eos_id

        # padded / vreg-aligned sizes
        self.HP = _round_up(hidden_size, 128)
        self.EP = _round_up(embed_size, 128)
        self.TV = self._choose_vocab_tile(vocab_tile, vmem_budget_bytes)
        self.VP = _round_up(vocab_size, self.TV)

        self.packed = self._pack_params(params)
        self._decode_cache = {}

    def _choose_vocab_tile(self, requested, budget_bytes):
        base_v = _round_up(self.V, 128)
        tv = min(_round_up(requested, 128), base_v)
        # weights that do not depend on the tile (bf16, double-buffer-conservative),
        # with a nominal 64-row LHS / logits estimate.
        fixed = 2 * (self.EP * 3 * self.HP * 2 + self.HP * 3 * self.HP * 2) \
            + 2 * 64 * self.HP * 4
        while tv > 128:
            vp = _round_up(self.V, tv)
            est = fixed + 3 * self.HP * tv * 2 + 2 * 64 * vp * 4
            if est <= budget_bytes:
                break
            tv -= 128
        return max(tv, 128)

    # ---- parameter packing: bf16 weights, f32 biases, tile-aligned padding ----
    def _pack_params(self, p):
        E, H, V = self.E, self.hidden_size, self.V
        EP, HP, VP = self.EP, self.HP, self.VP

        def pad_gates_w(w, rows_pad):  # [rows, 3H] -> [rows_pad, 3HP]
            out = jnp.zeros((rows_pad, 3 * HP), jnp.float32)
            for g in range(3):
                out = out.at[:w.shape[0], g * HP:g * HP + H].set(
                    w[:, g * H:(g + 1) * H])
            return out

        def pad_gates_b(b):            # [1, 3H] -> [1, 3HP]
            out = jnp.zeros((1, 3 * HP), jnp.float32)
            for g in range(3):
                out = out.at[:, g * HP:g * HP + H].set(b[:, g * H:(g + 1) * H])
            return out

        w_out = jnp.zeros((HP, VP), jnp.float32).at[:H, :V].set(p["w_out"])
        # padded vocab columns get a huge negative bias so they contribute
        # nothing to the logsumexp and are never selected (bias stays f32).
        b_out = jnp.full((1, VP), -1e30, jnp.float32).at[:, :V].set(p["b_out"])
        return {
            "emb": jnp.pad(p["emb"], ((0, 0), (0, EP - E))).astype(jnp.bfloat16),
            "w_ih": pad_gates_w(p["w_ih"], EP).astype(jnp.bfloat16),
            "w_hh": pad_gates_w(p["w_hh"], HP).astype(jnp.bfloat16),
            "b_ih": pad_gates_b(p["b_ih"]),
            "b_hh": pad_gates_b(p["b_hh"]),
            "w_out": w_out.astype(jnp.bfloat16),
            "b_out": b_out,
        }

    # ---- build the per-step pallas_call, with a pipeline_mode fallback ----
    def _build_step(self, BKP):
        EP, HP, VP, TV = self.EP, self.HP, self.VP, self.TV
        pp = self.packed
        dummy_x = jnp.zeros((BKP, EP), jnp.bfloat16)
        dummy_h = jnp.zeros((BKP, HP), jnp.float32)
        try:
            step = make_step_call(BKP, EP, HP, VP, TV, use_pipeline_mode=True)
            out = step(dummy_x, dummy_h, pp["w_ih"], pp["w_hh"],
                       pp["b_ih"], pp["b_hh"], pp["w_out"], pp["b_out"])
            jax.block_until_ready(out)
            return step
        except Exception:
            # Older JAX without BlockSpec(pipeline_mode=...) support.
            step = make_step_call(BKP, EP, HP, VP, TV, use_pipeline_mode=False)
            out = step(dummy_x, dummy_h, pp["w_ih"], pp["w_hh"],
                       pp["b_ih"], pp["b_hh"], pp["w_out"], pp["b_out"])
            jax.block_until_ready(out)
            return step

    # ---- build the jitted, device-resident decode scan for a given batch ----
    def _build_decode(self, b):
        k, V, H = self.k, self.V, self.hidden_size
        HP = self.HP
        BK = b * k
        BKP = _round_up(BK, 8)
        row_pad = BKP - BK
        EOS = self.EOS
        max_length = self.max_length

        step = self._build_step(BKP)
        pos_index_dev = (jnp.arange(b, dtype=jnp.int32) * k)[:, None]  # [b, 1]

        if row_pad:
            _pad_i32 = jnp.zeros((row_pad,), jnp.int32)

            def pad_rows_i32(v):
                return jnp.concatenate([v, _pad_i32], axis=0)
        else:
            def pad_rows_i32(v):
                return v

        @jax.jit
        def decode(pp, ids0, h0, ss0):
            def scan_step(carry, _):
                ids, h, seq_scores = carry                               # padded carry
                # embedding gather straight into the padded row layout
                x = jnp.take(pp["emb"], ids, axis=0)                     # [BKP, EP] bf16
                logp_full, hnew = step(
                    x, h, pp["w_ih"], pp["w_hh"], pp["b_ih"], pp["b_hh"],
                    pp["w_out"], pp["b_out"])                            # [BKP,VP], [BKP,HP]
                logp = logp_full[:BK, :V]                                # [BK, V] (normalized)

                # beam bookkeeping on device
                total = seq_scores + logp                                # [BK, V]
                scores, cands = jax.lax.top_k(total.reshape(b, k * V), k)
                symbols = (cands % V).astype(jnp.int32).reshape(BK)      # [BK]
                scores_col = scores.reshape(BK, 1)
                preds = ((cands // V).astype(jnp.int32)
                         + pos_index_dev).reshape(BK)                    # [BK]
                h_next = jnp.take(hnew, pad_rows_i32(preds), axis=0)     # [BKP, HP]
                seq_next = jnp.where(symbols[:, None] == EOS, -jnp.inf, scores_col)

                new_carry = (pad_rows_i32(symbols), h_next, seq_next)
                ys = (logp, scores_col, preds, symbols, h_next[:BK, :H])
                return new_carry, ys

            _, ys = jax.lax.scan(scan_step, (ids0, h0, ss0), None,
                                 length=max_length)
            return ys

        return decode, BK, BKP

    def forward(self, encoder_hidden):
        # encoder_hidden: [num_layers=1, batch, hidden]
        b = int(encoder_hidden.shape[1])
        k, V, H, HP = self.k, self.V, self.hidden_size, self.HP
        max_length = self.max_length

        if b not in self._decode_cache:
            self._decode_cache[b] = self._build_decode(b)
        decode, BK, BKP = self._decode_cache[b]
        row_pad = BKP - BK

        pos_index = np.arange(b, dtype=np.int64)[:, None] * k          # [b, 1]

        # inflate hidden: repeat_interleave along the beam dim, pad once.
        hidden = jnp.repeat(encoder_hidden.astype(jnp.float32), k, axis=1)[0]  # [BK, H]
        h0 = jnp.pad(hidden, ((0, row_pad), (0, HP - H)))                      # [BKP, HP]

        seq_scores = np.full((BK, 1), -np.inf, dtype=np.float32)
        seq_scores[np.arange(b) * k, 0] = 0.0
        ss0 = jnp.asarray(seq_scores)
        ids0 = jnp.full((BKP,), self.SOS, dtype=jnp.int32)

        ys = decode(self.packed, ids0, h0, ss0)
        ys = jax.block_until_ready(ys)
        logp_all, scores_all, preds_all, syms_all, hid_all = ys

        # single device -> host transfer, then data-dependent numpy backtracking
        logp_np = np.asarray(logp_all)                       # [T, BK, V]
        scores_np = np.asarray(scores_all)                   # [T, BK, 1]
        preds_np = np.asarray(preds_all).astype(np.int64)    # [T, BK]
        syms_np = np.asarray(syms_all).astype(np.int64)      # [T, BK]
        hid_np = np.asarray(hid_all)                         # [T, BK, H]

        stored_outputs = [logp_np[t] for t in range(max_length)]
        stored_scores = [scores_np[t] for t in range(max_length)]
        stored_predecessors = [preds_np[t][:, None] for t in range(max_length)]
        stored_symbols = [syms_np[t][:, None] for t in range(max_length)]
        stored_hidden = [hid_np[t][None, :, :] for t in range(max_length)]

        output, h_t, h_n, s, l, p = self._backtrack(
            stored_outputs, stored_hidden, stored_predecessors,
            stored_symbols, stored_scores, b, H, pos_index)

        decoder_outputs = [step[:, 0, :] for step in output]
        decoder_hidden = h_n[:, :, 0, :]

        metadata = {
            "inputs": None,
            "output": output,
            "h_t": h_t,
            "score": s,
            "topk_length": l,
            "topk_sequence": p,
            "length": [seq_len[0] for seq_len in l],
            "sequence": [seq[0] for seq in p],
        }
        return decoder_outputs, decoder_hidden, metadata

    def _backtrack(self, nw_output, nw_hidden, predecessors, symbols, scores,
                   b, hidden_size, pos_index):
        k = self.k
        max_length = self.max_length
        output, h_t, p = [], [], []
        h_n = np.zeros_like(nw_hidden[0])
        l = [[max_length] * k for _ in range(b)]

        last = scores[-1].reshape(b, k)
        sorted_idx = np.argsort(-last, axis=1, kind="stable")[:, :k]
        s = np.full((b, k), -np.inf, dtype=np.float32)
        batch_eos_found = [0] * b

        t = max_length - 1
        t_predecessors = (sorted_idx + pos_index).reshape(b * k)
        while t >= 0:
            current_output = nw_output[t][t_predecessors].copy()
            current_hidden = nw_hidden[t][:, t_predecessors, :].copy()
            current_symbol = symbols[t][t_predecessors].copy()
            t_predecessors = predecessors[t][t_predecessors, 0].copy()

            eos_indices = np.nonzero(symbols[t][:, 0] == self.EOS)[0]
            for i in range(len(eos_indices) - 1, -1, -1):
                idx = int(eos_indices[i])
                b_idx = idx // k
                res_k_idx = k - batch_eos_found[b_idx] % k - 1
                batch_eos_found[b_idx] += 1
                res_idx = b_idx * k + res_k_idx
                min_index = np.argmin(s, axis=1)
                min_score = s[np.arange(b), min_index]
                if min_score[b_idx] < scores[t][idx, 0]:
                    res_k_idx = int(min_index[b_idx])
                    res_idx = b_idx * k + res_k_idx
                    t_predecessors[res_idx] = predecessors[t][idx, 0]
                    current_output[res_idx, :] = nw_output[t][idx, :]
                    current_hidden[:, res_idx, :] = nw_hidden[t][:, idx, :]
                    h_n[:, res_idx, :] = nw_hidden[t][:, idx, :]
                    current_symbol[res_idx, :] = symbols[t][idx]
                    s[b_idx, res_k_idx] = scores[t][idx, 0]
                    l[b_idx][res_k_idx] = t + 1

            output.append(current_output)
            h_t.append(current_hidden)
            p.append(current_symbol)
            t -= 1

        re_sorted_local = np.argsort(-s, axis=1, kind="stable")[:, :k]
        s = np.take_along_axis(s, re_sorted_local, axis=1)
        for b_idx in range(b):
            l[b_idx] = [l[b_idx][int(k_idx)] for k_idx in re_sorted_local[b_idx]]
        re_sorted_idx = (re_sorted_local + pos_index).reshape(b * k)

        output = [step[re_sorted_idx].reshape(b, k, -1) for step in reversed(output)]
        p = [step[re_sorted_idx].reshape(b, k, -1) for step in reversed(p)]
        h_t = [step[:, re_sorted_idx, :].reshape(-1, b, k, hidden_size)
               for step in reversed(h_t)]
        h_n = h_n[:, re_sorted_idx, :].reshape(-1, b, k, hidden_size)
        return output, h_t, h_n, s, l, p


# -----------------------------------------------------------------------------
# Deterministic parameter init + demo run
# -----------------------------------------------------------------------------
def init_params(key, vocab, embed, hidden):
    ks = jax.random.split(key, 7)
    scale = 0.1
    return {
        "emb":   scale * jax.random.normal(ks[0], (vocab, embed), jnp.float32),
        "w_ih":  scale * jax.random.normal(ks[1], (embed, 3 * hidden), jnp.float32),
        "w_hh":  scale * jax.random.normal(ks[2], (hidden, 3 * hidden), jnp.float32),
        "b_ih":  scale * jax.random.normal(ks[3], (1, 3 * hidden), jnp.float32),
        "b_hh":  scale * jax.random.normal(ks[4], (1, 3 * hidden), jnp.float32),
        "w_out": scale * jax.random.normal(ks[5], (hidden, vocab), jnp.float32),
        "b_out": scale * jax.random.normal(ks[6], (1, vocab), jnp.float32),
    }


if __name__ == "__main__":
    batch, k = 2, 3
    vocab, embed, hidden = 16, 32, 32
    max_length = 8
    SOS, EOS = 1, 2

    key = jax.random.PRNGKey(0)
    pkey, hkey = jax.random.split(key)
    params = init_params(pkey, vocab, embed, hidden)

    # encoder_hidden: [num_layers=1, batch, hidden]   (no attention used)
    encoder_hidden = jax.random.normal(hkey, (1, batch, hidden), jnp.float32)
    # TODO(synk): attention / sin / length position-embedding branches of the
    # wrapped decoder RNN are not exercised (rnn.use_attention=False,
    # position_embedding=None), matching the default code path.

    dec = TopKDecoderPallas(params, k, hidden, vocab, embed, max_length, SOS, EOS)
    decoder_outputs, decoder_hidden, metadata = dec.forward(encoder_hidden)

    jax.block_until_ready(jnp.asarray(decoder_outputs[0]))
    jax.block_until_ready(jnp.asarray(decoder_hidden))

    assert len(decoder_outputs) == max_length
    assert decoder_outputs[0].shape == (batch, vocab)
    assert decoder_hidden.shape == (1, batch, hidden)
    assert metadata["score"].shape == (batch, k)
    assert np.all(np.isfinite(np.asarray(decoder_outputs[0])))
    print("KERNEL_OK")
</pallas_src>

<mosaic_0001>
module attributes {stable_mosaic.version = 11 : i64} {
  func.func @_decode_step_kernel(%arg0: i32, %arg1: memref<8x128xbf16, #tpu.memory_space<vmem>>, %arg2: memref<8x128xf32, #tpu.memory_space<vmem>>, %arg3: memref<128x384xbf16, #tpu.memory_space<vmem>>, %arg4: memref<128x384xbf16, #tpu.memory_space<vmem>>, %arg5: memref<1x384xf32, #tpu.memory_space<vmem>>, %arg6: memref<1x384xf32, #tpu.memory_space<vmem>>, %arg7: memref<128x128xbf16, #tpu.memory_space<vmem>>, %arg8: memref<1x128xf32, #tpu.memory_space<vmem>>, %arg9: memref<8x128xf32, #tpu.memory_space<vmem>>, %arg10: memref<8x128xf32, #tpu.memory_space<vmem>>, %arg11: memref<8x1xf32, #tpu.memory_space<vmem>>, %arg12: memref<8x1xf32, #tpu.memory_space<vmem>>) attributes {dimension_semantics = [#tpu.dimension_semantics<arbitrary>], iteration_bounds = array<i64: 1>, scalar_prefetch = 0 : i64, scratch_operands = 2 : i64, tpu.core_type = #tpu.core_type<tc>, window_params = [{pipeline_mode = #tpu.pipeline_mode<synchronous>, transform_indices = @transform_0, window_bounds = array<i64: 8, 128>}, {pipeline_mode = #tpu.pipeline_mode<synchronous>, transform_indices = @transform_1, window_bounds = array<i64: 8, 128>}, {pipeline_mode = #tpu.pipeline_mode<synchronous>, transform_indices = @transform_2, window_bounds = array<i64: 128, 384>}, {pipeline_mode = #tpu.pipeline_mode<synchronous>, transform_indices = @transform_3, window_bounds = array<i64: 128, 384>}, {pipeline_mode = #tpu.pipeline_mode<synchronous>, transform_indices = @transform_4, window_bounds = array<i64: 1, 384>}, {pipeline_mode = #tpu.pipeline_mode<synchronous>, transform_indices = @transform_5, window_bounds = array<i64: 1, 384>}, {transform_indices = @transform_6, window_bounds = array<i64: 128, 128>}, {transform_indices = @transform_7, window_bounds = array<i64: 1, 128>}, {pipeline_mode = #tpu.pipeline_mode<synchronous>, transform_indices = @transform_8, window_bounds = array<i64: 8, 128>}, {pipeline_mode = #tpu.pipeline_mode<synchronous>, transform_indices = @transform_9, window_bounds = array<i64: 8, 128>}]} {
    %c0_i32 = arith.constant 0 : i32
    %0 = arith.cmpi eq, %arg0, %c0_i32 : i32
    %1 = arith.extui %0 : i1 to i32
    %c0_i32_0 = arith.constant 0 : i32
    %2 = arith.cmpi ne, %1, %c0_i32_0 : i32
    scf.if %2 {
      %c0_19 = arith.constant 0 : index
      %c0_20 = arith.constant 0 : index
      %33 = vector.load %arg1[%c0_19, %c0_20] : memref<8x128xbf16, #tpu.memory_space<vmem>>, vector<8x128xbf16>
      %c0_21 = arith.constant 0 : index
      %c0_22 = arith.constant 0 : index
      %34 = vector.load %arg3[%c0_21, %c0_22] : memref<128x384xbf16, #tpu.memory_space<vmem>>, vector<128x384xbf16>
      %cst_23 = arith.constant dense<0.000000e+00> : vector<8x384xf32>
      %35 = tpu.matmul %33, %34, %cst_23 {dimension_numbers = #tpu.dot_dimension_numbers<[1], [0], [0], [1], [0, 0, 1, 1], [], []>} : vector<8x128xbf16>, vector<128x384xbf16>, vector<8x384xf32> -> vector<8x384xf32>
      %c0_24 = arith.constant 0 : index
      %c0_25 = arith.constant 0 : index
      %36 = vector.load %arg5[%c0_24, %c0_25] : memref<1x384xf32, #tpu.memory_space<vmem>>, vector<1x384xf32>
      %37 = vector.broadcast %36 : vector<1x384xf32> to vector<8x384xf32>
      %38 = arith.addf %35, %37 : vector<8x384xf32>
      %c0_26 = arith.constant 0 : index
      %c0_27 = arith.constant 0 : index
      %39 = vector.load %arg2[%c0_26, %c0_27] : memref<8x128xf32, #tpu.memory_space<vmem>>, vector<8x128xf32>
      %40 = arith.truncf %39 : vector<8x128xf32> to vector<8x128xbf16>
      %c0_28 = arith.constant 0 : index
      %c0_29 = arith.constant 0 : index
      %41 = vector.load %arg4[%c0_28, %c0_29] : memref<128x384xbf16, #tpu.memory_space<vmem>>, vector<128x384xbf16>
      %cst_30 = arith.constant dense<0.000000e+00> : vector<8x384xf32>
      %42 = tpu.matmul %40, %41, %cst_30 {dimension_numbers = #tpu.dot_dimension_numbers<[1], [0], [0], [1], [0, 0, 1, 1], [], []>} : vector<8x128xbf16>, vector<128x384xbf16>, vector<8x384xf32> -> vector<8x384xf32>
      %c0_31 = arith.constant 0 : index
      %c0_32 = arith.constant 0 : index
      %43 = vector.load %arg6[%c0_31, %c0_32] : memref<1x384xf32, #tpu.memory_space<vmem>>, vector<1x384xf32>
      %44 = vector.broadcast %43 : vector<1x384xf32> to vector<8x384xf32>
      %45 = arith.addf %42, %44 : vector<8x384xf32>
      %46 = vector.extract_strided_slice %38 {offsets = [0, 0], sizes = [8, 128], strides = [1, 1]} : vector<8x384xf32> to vector<8x128xf32>
      %47 = vector.extract_strided_slice %45 {offsets = [0, 0], sizes = [8, 128], strides = [1, 1]} : vector<8x384xf32> to vector<8x128xf32>
      %48 = arith.addf %46, %47 : vector<8x128xf32>
      %49 = arith.negf %48 : vector<8x128xf32>
      %50 = math.exp %49 : vector<8x128xf32>
      %cst_33 = arith.constant 1.000000e+00 : f32
      %51 = vector.broadcast %cst_33 : f32 to vector<8x128xf32>
      %52 = arith.addf %51, %50 : vector<8x128xf32>
      %53 = arith.divf %51, %52 : vector<8x128xf32>
      %54 = vector.extract_strided_slice %38 {offsets = [0, 128], sizes = [8, 128], strides = [1, 1]} : vector<8x384xf32> to vector<8x128xf32>
      %55 = vector.extract_strided_slice %45 {offsets = [0, 128], sizes = [8, 128], strides = [1, 1]} : vector<8x384xf32> to vector<8x128xf32>
      %56 = arith.addf %54, %55 : vector<8x128xf32>
      %57 = arith.negf %56 : vector<8x128xf32>
      %58 = math.exp %57 : vector<8x128xf32>
      %cst_34 = arith.constant 1.000000e+00 : f32
      %59 = vector.broadcast %cst_34 : f32 to vector<8x128xf32>
      %60 = arith.addf %59, %58 : vector<8x128xf32>
      %61 = arith.divf %59, %60 : vector<8x128xf32>
      %62 = vector.extract_strided_slice %38 {offsets = [0, 256], sizes = [8, 128], strides = [1, 1]} : vector<8x384xf32> to vector<8x128xf32>
      %63 = vector.extract_strided_slice %45 {offsets = [0, 256], sizes = [8, 128], strides = [1, 1]} : vector<8x384xf32> to vector<8x128xf32>
      %64 = arith.mulf %53, %63 : vector<8x128xf32>
      %65 = arith.addf %62, %64 : vector<8x128xf32>
      %66 = math.tanh %65 : vector<8x128xf32>
      %cst_35 = arith.constant 1.000000e+00 : f32
      %67 = vector.broadcast %cst_35 : f32 to vector<8x128xf32>
      %68 = arith.subf %67, %61 : vector<8x128xf32>
      %69 = arith.mulf %68, %66 : vector<8x128xf32>
      %70 = arith.mulf %61, %39 : vector<8x128xf32>
      %71 = arith.addf %69, %70 : vector<8x128xf32>
      %c0_36 = arith.constant 0 : index
      %c0_37 = arith.constant 0 : index
      %72 = vector.load %arg10[%c0_36, %c0_37] : memref<8x128xf32, #tpu.memory_space<vmem>>, vector<8x128xf32>
      tpu.vector_store %arg10[%c0_36, %c0_37], %71 {strides = array<i32>} : memref<8x128xf32, #tpu.memory_space<vmem>>, vector<8x128xf32>,
      %cst_38 = arith.constant 0xFF800000 : f32
      %73 = vector.broadcast %cst_38 : f32 to vector<8x1xf32>
      %c0_39 = arith.constant 0 : index
      %c0_40 = arith.constant 0 : index
      %74 = vector.load %arg11[%c0_39, %c0_40] : memref<8x1xf32, #tpu.memory_space<vmem>>, vector<8x1xf32>
      tpu.vector_store %arg11[%c0_39, %c0_40], %73 {strides = array<i32>} : memref<8x1xf32, #tpu.memory_space<vmem>>, vector<8x1xf32>,
      %cst_41 = arith.constant 0.000000e+00 : f32
      %75 = vector.broadcast %cst_41 : f32 to vector<8x1xf32>
      %c0_42 = arith.constant 0 : index
      %c0_43 = arith.constant 0 : index
      %76 = vector.load %arg12[%c0_42, %c0_43] : memref<8x1xf32, #tpu.memory_space<vmem>>, vector<8x1xf32>
      tpu.vector_store %arg12[%c0_42, %c0_43], %75 {strides = array<i32>} : memref<8x1xf32, #tpu.memory_space<vmem>>, vector<8x1xf32>,
    } else {
    }
    %c0 = arith.constant 0 : index
    %c0_1 = arith.constant 0 : index
    %3 = vector.load %arg10[%c0, %c0_1] : memref<8x128xf32, #tpu.memory_space<vmem>>, vector<8x128xf32>
    %4 = arith.truncf %3 : vector<8x128xf32> to vector<8x128xbf16>
    %c0_2 = arith.constant 0 : index
    %c0_3 = arith.constant 0 : index
    %5 = vector.load %arg7[%c0_2, %c0_3] : memref<128x128xbf16, #tpu.memory_space<vmem>>, vector<128x128xbf16>
    %cst = arith.constant dense<0.000000e+00> : vector<8x128xf32>
    %6 = tpu.matmul %4, %5, %cst {dimension_numbers = #tpu.dot_dimension_numbers<[1], [0], [0], [1], [0, 0, 1, 1], [], []>} : vector<8x128xbf16>, vector<128x128xbf16>, vector<8x128xf32> -> vector<8x128xf32>
    %c0_4 = arith.constant 0 : index
    %c0_5 = arith.constant 0 : index
    %7 = vector.load %arg8[%c0_4, %c0_5] : memref<1x128xf32, #tpu.memory_space<vmem>>, vector<1x128xf32>
    %8 = vector.broadcast %7 : vector<1x128xf32> to vector<8x128xf32>
    %9 = arith.addf %6, %8 : vector<8x128xf32>
    %c128_i32 = arith.constant 128 : i32
    %10 = arith.muli %arg0, %c128_i32 : i32
    %11 = tpu.assume_multiple %10, 128 : i32
    %c0_6 = arith.constant 0 : index
    %12 = arith.index_cast %11 : i32 to index
    %13 = vector.load %arg9[%c0_6, %12] : memref<8x128xf32, #tpu.memory_space<vmem>>, vector<8x128xf32>
    tpu.vector_store %arg9[%c0_6, %12], %9 {strides = array<i32>} : memref<8x128xf32, #tpu.memory_space<vmem>>, vector<8x128xf32>,
    %c0_7 = arith.constant 0 : index
    %c0_8 = arith.constant 0 : index
    %14 = vector.load %arg11[%c0_7, %c0_8] : memref<8x1xf32, #tpu.memory_space<vmem>>, vector<8x1xf32>
    %cst_9 = arith.constant dense<0xFF800000> : vector<8xf32>
    %15 = vector.multi_reduction <maximumf>, %9, %cst_9 [1] : vector<8x128xf32> to vector<8xf32>
    %16 = vector.shape_cast %15 : vector<8xf32> to vector<8x1xf32>
    %17 = arith.maximumf %14, %16 : vector<8x1xf32>
    %c0_10 = arith.constant 0 : index
    %c0_11 = arith.constant 0 : index
    %18 = vector.load %arg12[%c0_10, %c0_11] : memref<8x1xf32, #tpu.memory_space<vmem>>, vector<8x1xf32>
    %19 = arith.subf %14, %17 : vector<8x1xf32>
    %20 = math.exp %19 : vector<8x1xf32>
    %21 = arith.mulf %18, %20 : vector<8x1xf32>
    %22 = vector.broadcast %17 : vector<8x1xf32> to vector<8x128xf32>
    %23 = arith.subf %9, %22 : vector<8x128xf32>
    %24 = math.exp %23 : vector<8x128xf32>
    %cst_12 = arith.constant dense<0.000000e+00> : vector<8xf32>
    %25 = vector.multi_reduction <add>, %24, %cst_12 [1] : vector<8x128xf32> to vector<8xf32>
    %26 = vector.shape_cast %25 : vector<8xf32> to vector<8x1xf32>
    %27 = arith.addf %21, %26 : vector<8x1xf32>
    %c0_13 = arith.constant 0 : index
    %c0_14 = arith.constant 0 : index
    %28 = vector.load %arg12[%c0_13, %c0_14] : memref<8x1xf32, #tpu.memory_space<vmem>>, vector<8x1xf32>
    tpu.vector_store %arg12[%c0_13, %c0_14], %27 {strides = array<i32>} : memref<8x1xf32, #tpu.memory_space<vmem>>, vector<8x1xf32>,
    %c0_15 = arith.constant 0 : index
    %c0_16 = arith.constant 0 : index
    %29 = vector.load %arg11[%c0_15, %c0_16] : memref<8x1xf32, #tpu.memory_space<vmem>>, vector<8x1xf32>
    tpu.vector_store %arg11[%c0_15, %c0_16], %17 {strides = array<i32>} : memref<8x1xf32, #tpu.memory_space<vmem>>, vector<8x1xf32>,
    %c0_i32_17 = arith.constant 0 : i32
    %30 = arith.cmpi eq, %arg0, %c0_i32_17 : i32
    %31 = arith.extui %30 : i1 to i32
    %c0_i32_18 = arith.constant 0 : i32
    %32 = arith.cmpi ne, %31, %c0_i32_18 : i32
    scf.if %32 {
      %c0_19 = arith.constant 0 : index
      %c0_20 = arith.constant 0 : index
      %33 = vector.load %arg11[%c0_19, %c0_20] : memref<8x1xf32, #tpu.memory_space<vmem>>, vector<8x1xf32>
      %c0_21 = arith.constant 0 : index
      %c0_22 = arith.constant 0 : index
      %34 = vector.load %arg12[%c0_21, %c0_22] : memref<8x1xf32, #tpu.memory_space<vmem>>, vector<8x1xf32>
      %35 = math.log %34 : vector<8x1xf32>
      %36 = arith.addf %33, %35 : vector<8x1xf32>
      %c0_23 = arith.constant 0 : index
      %c0_24 = arith.constant 0 : index
      %37 = vector.load %arg9[%c0_23, %c0_24] : memref<8x128xf32, #tpu.memory_space<vmem>>, vector<8x128xf32>
      %38 = vector.broadcast %36 : vector<8x1xf32> to vector<8x128xf32>
      %39 = arith.subf %37, %38 : vector<8x128xf32>
      %c0_25 = arith.constant 0 : index
      %c0_26 = arith.constant 0 : index
      %40 = vector.load %arg9[%c0_25, %c0_26] : memref<8x128xf32, #tpu.memory_space<vmem>>, vector<8x128xf32>
      tpu.vector_store %arg9[%c0_25, %c0_26], %39 {strides = array<i32>} : memref<8x128xf32, #tpu.memory_space<vmem>>, vector<8x128xf32>,
    } else {
    }
    return
  }
  func.func @transform_0(%arg0: i32) -> (i32, i32) {
    %c0_i32 = arith.constant 0 : i32
    %c0_i32_0 = arith.constant 0 : i32
    %c0_i32_1 = arith.constant 0 : i32
    return %c0_i32, %c0_i32_0 : i32, i32
  }
  func.func @transform_1(%arg0: i32) -> (i32, i32) {
    %c0_i32 = arith.constant 0 : i32
    %c0_i32_0 = arith.constant 0 : i32
    %c0_i32_1 = arith.constant 0 : i32
    return %c0_i32, %c0_i32_0 : i32, i32
  }
  func.func @transform_2(%arg0: i32) -> (i32, i32) {
    %c0_i32 = arith.constant 0 : i32
    %c0_i32_0 = arith.constant 0 : i32
    %c0_i32_1 = arith.constant 0 : i32
    return %c0_i32, %c0_i32_0 : i32, i32
  }
  func.func @transform_3(%arg0: i32) -> (i32, i32) {
    %c0_i32 = arith.constant 0 : i32
    %c0_i32_0 = arith.constant 0 : i32
    %c0_i32_1 = arith.constant 0 : i32
    return %c0_i32, %c0_i32_0 : i32, i32
  }
  func.func @transform_4(%arg0: i32) -> (i32, i32) {
    %c0_i32 = arith.constant 0 : i32
    %c0_i32_0 = arith.constant 0 : i32
    %c0_i32_1 = arith.constant 0 : i32
    return %c0_i32, %c0_i32_0 : i32, i32
  }
  func.func @transform_5(%arg0: i32) -> (i32, i32) {
    %c0_i32 = arith.constant 0 : i32
    %c0_i32_0 = arith.constant 0 : i32
    %c0_i32_1 = arith.constant 0 : i32
    return %c0_i32, %c0_i32_0 : i32, i32
  }
  func.func @transform_6(%arg0: i32) -> (i32, i32) {
    %c0_i32 = arith.constant 0 : i32
    %c0_i32_0 = arith.constant 0 : i32
    return %c0_i32, %arg0 : i32, i32
  }
  func.func @transform_7(%arg0: i32) -> (i32, i32) {
    %c0_i32 = arith.constant 0 : i32
    %c0_i32_0 = arith.constant 0 : i32
    return %c0_i32, %arg0 : i32, i32
  }
  func.func @transform_8(%arg0: i32) -> (i32, i32) {
    %c0_i32 = arith.constant 0 : i32
    %c0_i32_0 = arith.constant 0 : i32
    %c0_i32_1 = arith.constant 0 : i32
    return %c0_i32, %c0_i32_0 : i32, i32
  }
  func.func @transform_9(%arg0: i32) -> (i32, i32) {
    %c0_i32 = arith.constant 0 : i32
    %c0_i32_0 = arith.constant 0 : i32
    %c0_i32_1 = arith.constant 0 : i32
    return %c0_i32, %c0_i32_0 : i32, i32
  }
}

module attributes {stable_mosaic.version = 11 : i64} {
  func.func @_decode_step_kernel(%arg0: i32, %arg1: memref<8x128xbf16, #tpu.memory_space<vmem>>, %arg2: memref<8x128xf32, #tpu.memory_space<vmem>>, %arg3: memref<128x384xbf16, #tpu.memory_space<vmem>>, %arg4: memref<128x384xbf16, #tpu.memory_space<vmem>>, %arg5: memref<1x384xf32, #tpu.memory_space<vmem>>, %arg6: memref<1x384xf32, #tpu.memory_space<vmem>>, %arg7: memref<128x128xbf16, #tpu.memory_space<vmem>>, %arg8: memref<1x128xf32, #tpu.memory_space<vmem>>, %arg9: memref<8x128xf32, #tpu.memory_space<vmem>>, %arg10: memref<8x128xf32, #tpu.memory_space<vmem>>, %arg11: memref<8x1xf32, #tpu.memory_space<vmem>>, %arg12: memref<8x1xf32, #tpu.memory_space<vmem>>) attributes {dimension_semantics = [#tpu.dimension_semantics<arbitrary>], iteration_bounds = array<i64: 1>, scalar_prefetch = 0 : i64, scratch_operands = 2 : i64, tpu.core_type = #tpu.core_type<tc>, window_params = [{pipeline_mode = #tpu.pipeline_mode<synchronous>, transform_indices = @transform_0, window_bounds = array<i64: 8, 128>}, {pipeline_mode = #tpu.pipeline_mode<synchronous>, transform_indices = @transform_1, window_bounds = array<i64: 8, 128>}, {pipeline_mode = #tpu.pipeline_mode<synchronous>, transform_indices = @transform_2, window_bounds = array<i64: 128, 384>}, {pipeline_mode = #tpu.pipeline_mode<synchronous>, transform_indices = @transform_3, window_bounds = array<i64: 128, 384>}, {pipeline_mode = #tpu.pipeline_mode<synchronous>, transform_indices = @transform_4, window_bounds = array<i64: 1, 384>}, {pipeline_mode = #tpu.pipeline_mode<synchronous>, transform_indices = @transform_5, window_bounds = array<i64: 1, 384>}, {transform_indices = @transform_6, window_bounds = array<i64: 128, 128>}, {transform_indices = @transform_7, window_bounds = array<i64: 1, 128>}, {pipeline_mode = #tpu.pipeline_mode<synchronous>, transform_indices = @transform_8, window_bounds = array<i64: 8, 128>}, {pipeline_mode = #tpu.pipeline_mode<synchronous>, transform_indices = @transform_9, window_bounds = array<i64: 8, 128>}]} {
    %c0_i32 = arith.constant 0 : i32
    %0 = arith.cmpi eq, %arg0, %c0_i32 : i32
    %1 = arith.extui %0 : i1 to i32
    %c0_i32_0 = arith.constant 0 : i32
    %2 = arith.cmpi ne, %1, %c0_i32_0 : i32
    scf.if %2 {
      %c0_19 = arith.constant 0 : index
      %c0_20 = arith.constant 0 : index
      %33 = vector.load %arg1[%c0_19, %c0_20] : memref<8x128xbf16, #tpu.memory_space<vmem>>, vector<8x128xbf16>
      %c0_21 = arith.constant 0 : index
      %c0_22 = arith.constant 0 : index
      %34 = vector.load %arg3[%c0_21, %c0_22] : memref<128x384xbf16, #tpu.memory_space<vmem>>, vector<128x384xbf16>
      %cst_23 = arith.constant dense<0.000000e+00> : vector<8x384xf32>
      %35 = tpu.matmul %33, %34, %cst_23 {dimension_numbers = #tpu.dot_dimension_numbers<[1], [0], [0], [1], [0, 0, 1, 1], [], []>} : vector<8x128xbf16>, vector<128x384xbf16>, vector<8x384xf32> -> vector<8x384xf32>
      %c0_24 = arith.constant 0 : index
      %c0_25 = arith.constant 0 : index
      %36 = vector.load %arg5[%c0_24, %c0_25] : memref<1x384xf32, #tpu.memory_space<vmem>>, vector<1x384xf32>
      %37 = vector.broadcast %36 : vector<1x384xf32> to vector<8x384xf32>
      %38 = arith.addf %35, %37 : vector<8x384xf32>
      %c0_26 = arith.constant 0 : index
      %c0_27 = arith.constant 0 : index
      %39 = vector.load %arg2[%c0_26, %c0_27] : memref<8x128xf32, #tpu.memory_space<vmem>>, vector<8x128xf32>
      %40 = arith.truncf %39 : vector<8x128xf32> to vector<8x128xbf16>
      %c0_28 = arith.constant 0 : index
      %c0_29 = arith.constant 0 : index
      %41 = vector.load %arg4[%c0_28, %c0_29] : memref<128x384xbf16, #tpu.memory_space<vmem>>, vector<128x384xbf16>
      %cst_30 = arith.constant dense<0.000000e+00> : vector<8x384xf32>
      %42 = tpu.matmul %40, %41, %cst_30 {dimension_numbers = #tpu.dot_dimension_numbers<[1], [0], [0], [1], [0, 0, 1, 1], [], []>} : vector<8x128xbf16>, vector<128x384xbf16>, vector<8x384xf32> -> vector<8x384xf32>
      %c0_31 = arith.constant 0 : index
      %c0_32 = arith.constant 0 : index
      %43 = vector.load %arg6[%c0_31, %c0_32] : memref<1x384xf32, #tpu.memory_space<vmem>>, vector<1x384xf32>
      %44 = vector.broadcast %43 : vector<1x384xf32> to vector<8x384xf32>
      %45 = arith.addf %42, %44 : vector<8x384xf32>
      %46 = vector.extract_strided_slice %38 {offsets = [0, 0], sizes = [8, 128], strides = [1, 1]} : vector<8x384xf32> to vector<8x128xf32>
      %47 = vector.extract_strided_slice %45 {offsets = [0, 0], sizes = [8, 128], strides = [1, 1]} : vector<8x384xf32> to vector<8x128xf32>
      %48 = arith.addf %46, %47 : vector<8x128xf32>
      %49 = arith.negf %48 : vector<8x128xf32>
      %50 = math.exp %49 : vector<8x128xf32>
      %cst_33 = arith.constant 1.000000e+00 : f32
      %51 = vector.broadcast %cst_33 : f32 to vector<8x128xf32>
      %52 = arith.addf %51, %50 : vector<8x128xf32>
      %53 = arith.divf %51, %52 : vector<8x128xf32>
      %54 = vector.extract_strided_slice %38 {offsets = [0, 128], sizes = [8, 128], strides = [1, 1]} : vector<8x384xf32> to vector<8x128xf32>
      %55 = vector.extract_strided_slice %45 {offsets = [0, 128], sizes = [8, 128], strides = [1, 1]} : vector<8x384xf32> to vector<8x128xf32>
      %56 = arith.addf %54, %55 : vector<8x128xf32>
      %57 = arith.negf %56 : vector<8x128xf32>
      %58 = math.exp %57 : vector<8x128xf32>
      %cst_34 = arith.constant 1.000000e+00 : f32
      %59 = vector.broadcast %cst_34 : f32 to vector<8x128xf32>
      %60 = arith.addf %59, %58 : vector<8x128xf32>
      %61 = arith.divf %59, %60 : vector<8x128xf32>
      %62 = vector.extract_strided_slice %38 {offsets = [0, 256], sizes = [8, 128], strides = [1, 1]} : vector<8x384xf32> to vector<8x128xf32>
      %63 = vector.extract_strided_slice %45 {offsets = [0, 256], sizes = [8, 128], strides = [1, 1]} : vector<8x384xf32> to vector<8x128xf32>
      %64 = arith.mulf %53, %63 : vector<8x128xf32>
      %65 = arith.addf %62, %64 : vector<8x128xf32>
      %66 = math.tanh %65 : vector<8x128xf32>
      %cst_35 = arith.constant 1.000000e+00 : f32
      %67 = vector.broadcast %cst_35 : f32 to vector<8x128xf32>
      %68 = arith.subf %67, %61 : vector<8x128xf32>
      %69 = arith.mulf %68, %66 : vector<8x128xf32>
      %70 = arith.mulf %61, %39 : vector<8x128xf32>
      %71 = arith.addf %69, %70 : vector<8x128xf32>
      %c0_36 = arith.constant 0 : index
      %c0_37 = arith.constant 0 : index
      %72 = vector.load %arg10[%c0_36, %c0_37] : memref<8x128xf32, #tpu.memory_space<vmem>>, vector<8x128xf32>
      tpu.vector_store %arg10[%c0_36, %c0_37], %71 {strides = array<i32>} : memref<8x128xf32, #tpu.memory_space<vmem>>, vector<8x128xf32>,
      %cst_38 = arith.constant 0xFF800000 : f32
      %73 = vector.broadcast %cst_38 : f32 to vector<8x1xf32>
      %c0_39 = arith.constant 0 : index
      %c0_40 = arith.constant 0 : index
      %74 = vector.load %arg11[%c0_39, %c0_40] : memref<8x1xf32, #tpu.memory_space<vmem>>, vector<8x1xf32>
      tpu.vector_store %arg11[%c0_39, %c0_40], %73 {strides = array<i32>} : memref<8x1xf32, #tpu.memory_space<vmem>>, vector<8x1xf32>,
      %cst_41 = arith.constant 0.000000e+00 : f32
      %75 = vector.broadcast %cst_41 : f32 to vector<8x1xf32>
      %c0_42 = arith.constant 0 : index
      %c0_43 = arith.constant 0 : index
      %76 = vector.load %arg12[%c0_42, %c0_43] : memref<8x1xf32, #tpu.memory_space<vmem>>, vector<8x1xf32>
      tpu.vector_store %arg12[%c0_42, %c0_43], %75 {strides = array<i32>} : memref<8x1xf32, #tpu.memory_space<vmem>>, vector<8x1xf32>,
    } else {
    }
    %c0 = arith.constant 0 : index
    %c0_1 = arith.constant 0 : index
    %3 = vector.load %arg10[%c0, %c0_1] : memref<8x128xf32, #tpu.memory_space<vmem>>, vector<8x128xf32>
    %4 = arith.truncf %3 : vector<8x128xf32> to vector<8x128xbf16>
    %c0_2 = arith.constant 0 : index
    %c0_3 = arith.constant 0 : index
    %5 = vector.load %arg7[%c0_2, %c0_3] : memref<128x128xbf16, #tpu.memory_space<vmem>>, vector<128x128xbf16>
    %cst = arith.constant dense<0.000000e+00> : vector<8x128xf32>
    %6 = tpu.matmul %4, %5, %cst {dimension_numbers = #tpu.dot_dimension_numbers<[1], [0], [0], [1], [0, 0, 1, 1], [], []>} : vector<8x128xbf16>, vector<128x128xbf16>, vector<8x128xf32> -> vector<8x128xf32>
    %c0_4 = arith.constant 0 : index
    %c0_5 = arith.constant 0 : index
    %7 = vector.load %arg8[%c0_4, %c0_5] : memref<1x128xf32, #tpu.memory_space<vmem>>, vector<1x128xf32>
    %8 = vector.broadcast %7 : vector<1x128xf32> to vector<8x128xf32>
    %9 = arith.addf %6, %8 : vector<8x128xf32>
    %c128_i32 = arith.constant 128 : i32
    %10 = arith.muli %arg0, %c128_i32 : i32
    %11 = tpu.assume_multiple %10, 128 : i32
    %c0_6 = arith.constant 0 : index
    %12 = arith.index_cast %11 : i32 to index
    %13 = vector.load %arg9[%c0_6, %12] : memref<8x128xf32, #tpu.memory_space<vmem>>, vector<8x128xf32>
    tpu.vector_store %arg9[%c0_6, %12], %9 {strides = array<i32>} : memref<8x128xf32, #tpu.memory_space<vmem>>, vector<8x128xf32>,
    %c0_7 = arith.constant 0 : index
    %c0_8 = arith.constant 0 : index
    %14 = vector.load %arg11[%c0_7, %c0_8] : memref<8x1xf32, #tpu.memory_space<vmem>>, vector<8x1xf32>
    %cst_9 = arith.constant dense<0xFF800000> : vector<8xf32>
    %15 = vector.multi_reduction <maximumf>, %9, %cst_9 [1] : vector<8x128xf32> to vector<8xf32>
    %16 = vector.shape_cast %15 : vector<8xf32> to vector<8x1xf32>
    %17 = arith.maximumf %14, %16 : vector<8x1xf32>
    %c0_10 = arith.constant 0 : index
    %c0_11 = arith.constant 0 : index
    %18 = vector.load %arg12[%c0_10, %c0_11] : memref<8x1xf32, #tpu.memory_space<vmem>>, vector<8x1xf32>
    %19 = arith.subf %14, %17 : vector<8x1xf32>
    %20 = math.exp %19 : vector<8x1xf32>
    %21 = arith.mulf %18, %20 : vector<8x1xf32>
    %22 = vector.broadcast %17 : vector<8x1xf32> to vector<8x128xf32>
    %23 = arith.subf %9, %22 : vector<8x128xf32>
    %24 = math.exp %23 : vector<8x128xf32>
    %cst_12 = arith.constant dense<0.000000e+00> : vector<8xf32>
    %25 = vector.multi_reduction <add>, %24, %cst_12 [1] : vector<8x128xf32> to vector<8xf32>
    %26 = vector.shape_cast %25 : vector<8xf32> to vector<8x1xf32>
    %27 = arith.addf %21, %26 : vector<8x1xf32>
    %c0_13 = arith.constant 0 : index
    %c0_14 = arith.constant 0 : index
    %28 = vector.load %arg12[%c0_13, %c0_14] : memref<8x1xf32, #tpu.memory_space<vmem>>, vector<8x1xf32>
    tpu.vector_store %arg12[%c0_13, %c0_14], %27 {strides = array<i32>} : memref<8x1xf32, #tpu.memory_space<vmem>>, vector<8x1xf32>,
    %c0_15 = arith.constant 0 : index
    %c0_16 = arith.constant 0 : index
    %29 = vector.load %arg11[%c0_15, %c0_16] : memref<8x1xf32, #tpu.memory_space<vmem>>, vector<8x1xf32>
    tpu.vector_store %arg11[%c0_15, %c0_16], %17 {strides = array<i32>} : memref<8x1xf32, #tpu.memory_space<vmem>>, vector<8x1xf32>,
    %c0_i32_17 = arith.constant 0 : i32
    %30 = arith.cmpi eq, %arg0, %c0_i32_17 : i32
    %31 = arith.extui %30 : i1 to i32
    %c0_i32_18 = arith.constant 0 : i32
    %32 = arith.cmpi ne, %31, %c0_i32_18 : i32
    scf.if %32 {
      %c0_19 = arith.constant 0 : index
      %c0_20 = arith.constant 0 : index
      %33 = vector.load %arg11[%c0_19, %c0_20] : memref<8x1xf32, #tpu.memory_space<vmem>>, vector<8x1xf32>
      %c0_21 = arith.constant 0 : index
      %c0_22 = arith.constant 0 : index
      %34 = vector.load %arg12[%c0_21, %c0_22] : memref<8x1xf32, #tpu.memory_space<vmem>>, vector<8x1xf32>
      %35 = math.log %34 : vector<8x1xf32>
      %36 = arith.addf %33, %35 : vector<8x1xf32>
      %c0_23 = arith.constant 0 : index
      %c0_24 = arith.constant 0 : index
      %37 = vector.load %arg9[%c0_23, %c0_24] : memref<8x128xf32, #tpu.memory_space<vmem>>, vector<8x128xf32>
      %38 = vector.broadcast %36 : vector<8x1xf32> to vector<8x128xf32>
      %39 = arith.subf %37, %38 : vector<8x128xf32>
      %c0_25 = arith.constant 0 : index
      %c0_26 = arith.constant 0 : index
      %40 = vector.load %arg9[%c0_25, %c0_26] : memref<8x128xf32, #tpu.memory_space<vmem>>, vector<8x128xf32>
      tpu.vector_store %arg9[%c0_25, %c0_26], %39 {strides = array<i32>} : memref<8x128xf32, #tpu.memory_space<vmem>>, vector<8x128xf32>,
    } else {
    }
    return
  }
  func.func @transform_0(%arg0: i32) -> (i32, i32) {
    %c0_i32 = arith.constant 0 : i32
    %c0_i32_0 = arith.constant 0 : i32
    %c0_i32_1 = arith.constant 0 : i32
    return %c0_i32, %c0_i32_0 : i32, i32
  }
  func.func @transform_1(%arg0: i32) -> (i32, i32) {
    %c0_i32 = arith.constant 0 : i32
    %c0_i32_0 = arith.constant 0 : i32
    %c0_i32_1 = arith.constant 0 : i32
    return %c0_i32, %c0_i32_0 : i32, i32
  }
  func.func @transform_2(%arg0: i32) -> (i32, i32) {
    %c0_i32 = arith.constant 0 : i32
    %c0_i32_0 = arith.constant 0 : i32
    %c0_i32_1 = arith.constant 0 : i32
    return %c0_i32, %c0_i32_0 : i32, i32
  }
  func.func @transform_3(%arg0: i32) -> (i32, i32) {
    %c0_i32 = arith.constant 0 : i32
    %c0_i32_0 = arith.constant 0 : i32
    %c0_i32_1 = arith.constant 0 : i32
    return %c0_i32, %c0_i32_0 : i32, i32
  }
  func.func @transform_4(%arg0: i32) -> (i32, i32) {
    %c0_i32 = arith.constant 0 : i32
    %c0_i32_0 = arith.constant 0 : i32
    %c0_i32_1 = arith.constant 0 : i32
    return %c0_i32, %c0_i32_0 : i32, i32
  }
  func.func @transform_5(%arg0: i32) -> (i32, i32) {
    %c0_i32 = arith.constant 0 : i32
    %c0_i32_0 = arith.constant 0 : i32
    %c0_i32_1 = arith.constant 0 : i32
    return %c0_i32, %c0_i32_0 : i32, i32
  }
  func.func @transform_6(%arg0: i32) -> (i32, i32) {
    %c0_i32 = arith.constant 0 : i32
    %c0_i32_0 = arith.constant 0 : i32
    return %c0_i32, %arg0 : i32, i32
  }
  func.func @transform_7(%arg0: i32) -> (i32, i32) {
    %c0_i32 = arith.constant 0 : i32
    %c0_i32_0 = arith.constant 0 : i32
    return %c0_i32, %arg0 : i32, i32
  }
  func.func @transform_8(%arg0: i32) -> (i32, i32) {
    %c0_i32 = arith.constant 0 : i32
    %c0_i32_0 = arith.constant 0 : i32
    %c0_i32_1 = arith.constant 0 : i32
    return %c0_i32, %c0_i32_0 : i32, i32
  }
  func.func @transform_9(%arg0: i32) -> (i32, i32) {
    %c0_i32 = arith.constant 0 : i32
    %c0_i32_0 = arith.constant 0 : i32
    %c0_i32_1 = arith.constant 0 : i32
    return %c0_i32, %c0_i32_0 : i32, i32
  }
}

</mosaic_0001>

<bundles_post_ra>
// kernel: tpu_custom_call.1
= control target key start
LH: loop header
LB: loop body
LE: loop exit
PB: predicated region body
PF: predicated region fallthrough
CT: control target
= control target key end

     0   :  { %15 = vsyncpa [#allocation5], 0  ;;  %s1466_s0 = inlined_call_operand.hbm [shape: bf16[8,128], index: 0, kind: input, shape index: {}]   ;;  %s1467_s1 = inlined_call_operand.hbm [shape: f32[8,128], index: 1, kind: input, shape index: {}]   ;;  %s1468_s2 = inlined_call_operand.hbm [shape: bf16[128,384], index: 2, kind: input, shape index: {}]   ;;  %s1469_s3 = inlined_call_operand.hbm [shape: bf16[128,384], index: 3, kind: input, shape index: {}]   ;;  %s1470_s4 = inlined_call_operand.vmem [shape: f32[1,384], index: 4, kind: input, shape index: {}]   ;;  %s1471_s5 = inlined_call_operand.vmem [shape: f32[1,384], index: 5, kind: input, shape index: {}]   ;;  %s1472_s6 = inlined_call_operand.hbm [shape: bf16[128,128], index: 6, kind: input, shape index: {}]   ;;  %s1473_s7 = inlined_call_operand.vmem [shape: f32[1,128], index: 7, kind: input, shape index: {}]   ;;  %s1474_s8 = inlined_call_operand.hbm [shape: f32[8,128], index: 8, kind: output, shape index: {0}]   ;;  %s1475_s9 = inlined_call_operand.hbm [shape: f32[8,128], index: 9, kind: output, shape index: {1}]  }
   0x1   :  { %16 = vsyncpa [#allocation8], 0 }
   0x2   :  { %17 = vsyncpa [#allocation11], 0 }
   0x3   :  { %18 = vsyncpa [#allocation6], 0 }
   0x4   :  { %19 = vsyncpa [#allocation15], 0  ;;  %s1258_s30 = smov [#allocation7]   ;;  %s1094_s13 = scalar_lea.hbm %s1467_s1, 128 }
   0x5   :  { %s36_s10 = sshll.u32 %s1258_s30, 4  ;;  %p1095_p0 = scmp.ne.s32.totalorder %s1467_s1, %s1094_s13  ;;  %s37_s10 = int_to_ptr.vmem [resolvable:$true] %s36_s10 }
   0x6   :  { %p1098_p1 = scmp.lt.u32.totalorder %s1094_s13, %s1467_s1 }
   0x8   :  { %p1100_p2 = pnand %p1098_p1, %p1095_p0 }
   0xa   :  { %1103 = shalt.err (!%p1100_p2)
}
   0xb   :  { %s1104_s18 = scalar_lea.vmem %s37_s10, 128  ;;  %p1109_p4 = scmp.lt.s32.totalorder %s37_s10, %s37_s10 }
   0xc   :  { %p1105_p3 = scmp.ne.s32.totalorder %s37_s10, %s1104_s18  ;;  %p1110_p5 = scmp.lt.s32.totalorder %s1104_s18, %s1104_s18 }
   0xe   :  { %p1111_p6 = por %p1110_p5, %p1109_p4 }
  0x10   :  { %p1112_p7 = pnand %p1111_p6, %p1105_p3 }
  0x12   :  { %1115 = shalt.err (!%p1112_p7)
}
  0x13   :  { %39 = dma.hbm_to_vmem [thread:$0]  %s1467_s1, 128, %s37_s10, [#allocation8]  }
  0x14   :  { %s1259_s21 = smov [#allocation10]   ;;  %s1260_s23 = smov [#allocation4]  }
  0x15   :  { %s57_s22 = sshll.u32 %s1259_s21, 4  ;;  %s26_s24 = sshll.u32 %s1260_s23, 4  ;;  %s58_s22 = int_to_ptr.vmem [resolvable:$true] %s57_s22  ;;  %s27_s24 = int_to_ptr.vmem [resolvable:$true] %s26_s24 }
  0x16   :  { %s1116_s27 = scalar_lea.hbm %s1469_s3, 3072 }
  0x17   :  { %p1117_p8 = scmp.ne.s32.totalorder %s1469_s3, %s1116_s27  ;;  %p1120_p9 = scmp.lt.u32.totalorder %s1116_s27, %s1469_s3 }
  0x19   :  { %p1122_p10 = pnand %p1120_p9, %p1117_p8 }
  0x1b   :  { %1125 = shalt.err (!%p1122_p10)
}
  0x1c   :  { %s1126_s1 = scalar_lea.vmem %s58_s22, 3072  ;;  %p1131_p12 = scmp.lt.s32.totalorder %s58_s22, %s58_s22 }
  0x1d   :  { %p1127_p11 = scmp.ne.s32.totalorder %s58_s22, %s1126_s1  ;;  %p1132_p13 = scmp.lt.s32.totalorder %s1126_s1, %s1126_s1 }
  0x1f   :  { %p1133_p0 = por %p1132_p13, %p1131_p12 }
  0x21   :  { %p1134_p1 = pnand %p1133_p0, %p1127_p11 }
  0x23   :  { %1137 = shalt.err (!%p1134_p1)
}
  0x24   :  { %s1261_s10 = smov 192   ;;  %s1262_s12 = smov 12  }
  0x25   :  { %63 = dma.hbm_to_vmem [thread:$0]  %s1469_s3, 3072, %s58_s22, [#allocation11], %s1261_s10, %s1261_s10, %s1262_s12  }
  0x26   :  { %s1138_s17 = scalar_lea.hbm %s1466_s0, 64 }
  0x27   :  { %p1139_p2 = scmp.ne.s32.totalorder %s1466_s0, %s1138_s17  ;;  %p1142_p3 = scmp.lt.u32.totalorder %s1138_s17, %s1466_s0 }
  0x29   :  { %p1144_p4 = pnand %p1142_p3, %p1139_p2 }
  0x2b   :  { %1147 = shalt.err (!%p1144_p4)
}
  0x2c   :  { %s1148_s23 = scalar_lea.vmem %s27_s24, 64  ;;  %p1153_p6 = scmp.lt.s32.totalorder %s27_s24, %s27_s24 }
  0x2d   :  { %p1149_p5 = scmp.ne.s32.totalorder %s27_s24, %s1148_s23  ;;  %p1154_p7 = scmp.lt.s32.totalorder %s1148_s23, %s1148_s23 }
  0x2f   :  { %p1155_p8 = por %p1154_p7, %p1153_p6 }
  0x31   :  { %p1156_p9 = pnand %p1155_p8, %p1149_p5 }
  0x33   :  { %1159 = shalt.err (!%p1156_p9)
}
  0x34   :  { %29 = dma.hbm_to_vmem [thread:$0]  %s1466_s0, 64, %s27_s24, [#allocation5]  }
  0x35   :  { %s1263_s25 = smov [#allocation9]   ;;  %s1264_s27 = smov [#allocation12]  }
  0x36   :  { %s45_s26 = sshll.u32 %s1263_s25, 4  ;;  %s73_s28 = sshll.u32 %s1264_s27, 4  ;;  %s46_s26 = int_to_ptr.vmem [resolvable:$true] %s45_s26  ;;  %s74_s28 = int_to_ptr.vmem [resolvable:$true] %s73_s28 }
  0x37   :  { %s1160_s11 = scalar_lea.hbm %s1468_s2, 3072 }
  0x38   :  { %p1161_p10 = scmp.ne.s32.totalorder %s1468_s2, %s1160_s11  ;;  %p1164_p11 = scmp.lt.u32.totalorder %s1160_s11, %s1468_s2 }
  0x3a   :  { %p1166_p12 = pnand %p1164_p11, %p1161_p10 }
  0x3c   :  { %1169 = shalt.err (!%p1166_p12)
}
  0x3d   :  { %s1170_s0 = scalar_lea.vmem %s46_s26, 3072  ;;  %p1175_p0 = scmp.lt.s32.totalorder %s46_s26, %s46_s26 }
  0x3e   :  { %p1171_p13 = scmp.ne.s32.totalorder %s46_s26, %s1170_s0  ;;  %p1176_p1 = scmp.lt.s32.totalorder %s1170_s0, %s1170_s0 }
  0x40   :  { %p1177_p2 = por %p1176_p1, %p1175_p0 }
  0x42   :  { %p1178_p3 = pnand %p1177_p2, %p1171_p13 }
  0x44   :  { %1181 = shalt.err (!%p1178_p3)
}
  0x45   :  { %51 = dma.hbm_to_vmem [thread:$0]  %s1468_s2, 3072, %s46_s26, [#allocation8], %s1261_s10, %s1261_s10, %s1262_s12  }
  0x46   :  { %s1182_s19 = scalar_lea.hbm %s1472_s6, 1024 }
  0x47   :  { %p1183_p4 = scmp.ne.s32.totalorder %s1472_s6, %s1182_s19  ;;  %p1186_p5 = scmp.lt.u32.totalorder %s1182_s19, %s1472_s6 }
  0x49   :  { %p1188_p6 = pnand %p1186_p5, %p1183_p4 }
  0x4b   :  { %1191 = shalt.err (!%p1188_p6)
}
  0x4c   :  { %s1192_s22 = scalar_lea.vmem %s74_s28, 1024  ;;  %p1197_p8 = scmp.lt.s32.totalorder %s74_s28, %s74_s28 }
  0x4d   :  { %p1193_p7 = scmp.ne.s32.totalorder %s74_s28, %s1192_s22  ;;  %p1198_p9 = scmp.lt.s32.totalorder %s1192_s22, %s1192_s22 }
  0x4f   :  { %p1199_p10 = por %p1198_p9, %p1197_p8 }
  0x51   :  { %p1200_p11 = pnand %p1199_p10, %p1193_p7 }
  0x53   :  { %1203 = shalt.err (!%p1200_p11)
}
  0x54   :  { %s1265_s2 = smov 64   ;;  %s1266_s10 = smov 4  }
  0x55   :  { %79 = dma.hbm_to_vmem [thread:$0]  %s1472_s6, 1024, %s74_s28, [#allocation11], %s1265_s2, %s1265_s2, %s1266_s10  }
  0x56   :  { %1248 = dma.done.wait [#allocation5], 64  }
  0x57   :  { %1249 = vsyncadd [#allocation5], 4294967232 }
  0x58   :  { %1250 = dma.done.wait [#allocation8], 3200  }
  0x59   :  { %1251 = vsyncadd [#allocation8], 4294964096 }
  0x5a   :  { %1252 = dma.done.wait [#allocation11], 4096  }
  0x5b   :  { %1253 = vsyncadd [#allocation11], 4294963200  ;;  %v1267_v0 = vmov 0.0   ;;  %v1268_v1 = vmov 0   ;;  %vm1269_vm0 = vmmov 0   ;;  %v1410_v48 = vld [vmem:[#allocation7] sm:$0xff] }
  0x5c   :  { %921 = vmatprep.subr.bf16.mxu1 %v1267_v0  ;;  %312 = vmatprep.mubr.bf16.mxu0 %v1268_v1  ;;  %v1006_v2 = vld [vmem:[#allocation9 + $0x4] ss:$12 sps:$4 sm:$0xff]   ;;  %v1008_v3 = vld [vmem:[#allocation9] ss:$12 sps:$4 sm:$0xff]   ;;  %v1009_v4 = vld [vmem:[#allocation9 + $0x1c] ss:$12 sps:$4 sm:$0xff]   ;;  %v362_v50 = vpack.c.bf16 %v1410_v48, %v1410_v48 }
  0x5d   :  { %937 = vmatprep.mubr.msk.bf16.mxu1 %vm1269_vm0, %v1267_v0  ;;  %1004 = vset.pattern.permute.xlu0 %v1268_v1  ;;  %v1011_v5 = vld [vmem:[#allocation9 + $0x18] ss:$12 sps:$4 sm:$0xff]   ;;  %v1012_v6 = vld [vmem:[#allocation9 + $0x34] ss:$12 sps:$4 sm:$0xff]   ;;  %v1014_v7 = vld [vmem:[#allocation9 + $0x30] ss:$12 sps:$4 sm:$0xff]  }
  0x5e   :  { %1005 = vset.pattern.permute.xlu1 %v1268_v1  ;;  %280 = vmatprep.subr.bf16.mxu0 %v1006_v2  ;;  %v1015_v8 = vld [vmem:[#allocation9 + $0x4c] ss:$12 sps:$4 sm:$0xff]   ;;  %v1026_v9 = vld [vmem:[#allocation9 + $0x8] ss:$12 sps:$4 sm:$0xff]   ;;  %v1018_v11 = vld [vmem:[#allocation9 + $0x64] ss:$12 sps:$4 sm:$0xff]   ;;  %v137_v2 = vlaneseq }
  0x5f   :  { %281 = vmatpush1.bf16.msra.mxu0 %v1008_v3  ;;  %v1017_v10 = vld [vmem:[#allocation9 + $0x48] ss:$12 sps:$4 sm:$0xff]   ;;  %922 = vmatpush3.bf16.msra.mxu1 %v1026_v9  ;;  %v1030_v12 = vld [vmem:[#allocation9 + $0x20] ss:$12 sps:$4 sm:$0xff]   ;;  %v1032_v14 = vld [vmem:[#allocation9 + $0x38] ss:$12 sps:$4 sm:$0xff]  }
  0x60   :  { %282 = vmatprep.subr.bf16.mxu0 %v1009_v4  ;;  %923 = vmatprep.subr.bf16.mxu1 %v1267_v0  ;;  %v1020_v13 = vld [vmem:[#allocation9 + $0x60] ss:$12 sps:$4 sm:$0xff]   ;;  %v1021_v15 = vld [vmem:[#allocation9 + $0x7c] ss:$12 sps:$4 sm:$0xff]   ;;  %v1023_v16 = vld [vmem:[#allocation9 + $0x78] ss:$12 sps:$4 sm:$0xff]  }
  0x61   :  { %v1036_v17 = vld [vmem:[#allocation9 + $0x50] ss:$12 sps:$4 sm:$0xff]   ;;  %v1024_v18 = vld [vmem:[#allocation9 + $0x94] ss:$12 sps:$4 sm:$0xff]   ;;  %v1028_v21 = vld [vmem:[#allocation9 + $0xac] ss:$12 sps:$4 sm:$0xff]  }
  0x62   :  { %v1027_v19 = vld [vmem:[#allocation9 + $0x90] ss:$12 sps:$4 sm:$0xff]   ;;  %v1040_v20 = vld [vmem:[#allocation9 + $0x68] ss:$12 sps:$4 sm:$0xff]   ;;  %v1044_v23 = vld [vmem:[#allocation9 + $0x80] ss:$12 sps:$4 sm:$0xff]  }
  0x63   :  { %283 = vmatpush1.bf16.msra.mxu0 %v1011_v5  ;;  %924 = vmatpush3.bf16.msra.mxu1 %v1030_v12  ;;  %v1031_v22 = vld [vmem:[#allocation9 + $0xa8] ss:$12 sps:$4 sm:$0xff]   ;;  %v1035_v24 = vld [vmem:[#allocation10 + $0x4] ss:$12 sps:$4 sm:$0xff]   ;;  %v1033_v25 = vld [vmem:[#allocation10] ss:$12 sps:$4 sm:$0xff]  }
  0x64   :  { %284 = vmatprep.subr.bf16.mxu0 %v1012_v6  ;;  %925 = vmatprep.subr.bf16.mxu1 %v1267_v0  ;;  %v102_v26 = vld [vmem:[#allocation4] sm:$0xf]  ;;  %v1048_v27 = vld [vmem:[#allocation9 + $0x98] ss:$12 sps:$4 sm:$0xff]   ;;  %v1039_v28 = vld [vmem:[#allocation10 + $0x1c] ss:$12 sps:$4 sm:$0xff]  }
  0x65   :  { %v1037_v29 = vld [vmem:[#allocation10 + $0x18] ss:$12 sps:$4 sm:$0xff]   ;;  %v1052_v30 = vld [vmem:[#allocation9 + $0xb0] ss:$12 sps:$4 sm:$0xff]   ;;  %v1043_v31 = vld [vmem:[#allocation10 + $0x34] ss:$12 sps:$4 sm:$0xff]  }
  0x66   :  { %v1041_v32 = vld [vmem:[#allocation10 + $0x30] ss:$12 sps:$4 sm:$0xff]   ;;  %v1047_v33 = vld [vmem:[#allocation10 + $0x4c] ss:$12 sps:$4 sm:$0xff]   ;;  %v1059_v34 = vld [vmem:[#allocation10 + $0x8] ss:$12 sps:$4 sm:$0xff]  }
  0x67   :  { %285 = vmatpush1.bf16.msra.mxu0 %v1014_v7  ;;  %926 = vmatpush3.bf16.msra.mxu1 %v1032_v14  ;;  %v1045_v35 = vld [vmem:[#allocation10 + $0x48] ss:$12 sps:$4 sm:$0xff]   ;;  %v1063_v36 = vld [vmem:[#allocation10 + $0x20] ss:$12 sps:$4 sm:$0xff]   ;;  %v1051_v37 = vld [vmem:[#allocation10 + $0x64] ss:$12 sps:$4 sm:$0xff]  }
  0x68   :  { %286 = vmatprep.subr.bf16.mxu0 %v1015_v8  ;;  %927 = vmatprep.subr.bf16.mxu1 %v1267_v0  ;;  %v1049_v38 = vld [vmem:[#allocation10 + $0x60] ss:$12 sps:$4 sm:$0xff]   ;;  %v1064_v39 = vld [vmem:[#allocation10 + $0x38] ss:$12 sps:$4 sm:$0xff]   ;;  %v1055_v40 = vld [vmem:[#allocation10 + $0x7c] ss:$12 sps:$4 sm:$0xff]  }
  0x69   :  { %v1053_v41 = vld [vmem:[#allocation10 + $0x78] ss:$12 sps:$4 sm:$0xff]   ;;  %v1065_v42 = vld [vmem:[#allocation10 + $0x50] ss:$12 sps:$4 sm:$0xff]   ;;  %v1058_v43 = vld [vmem:[#allocation10 + $0x94] ss:$12 sps:$4 sm:$0xff]  }
  0x6a   :  { %v1056_v44 = vld [vmem:[#allocation10 + $0x90] ss:$12 sps:$4 sm:$0xff]   ;;  %v1066_v45 = vld [vmem:[#allocation10 + $0x68] ss:$12 sps:$4 sm:$0xff]   ;;  %v1062_v46 = vld [vmem:[#allocation10 + $0xac] ss:$12 sps:$4 sm:$0xff]  }
  0x6b   :  { %287 = vmatpush1.bf16.msra.mxu0 %v1017_v10  ;;  %928 = vmatpush3.bf16.msra.mxu1 %v1036_v17  ;;  %v1060_v47 = vld [vmem:[#allocation10 + $0xa8] ss:$12 sps:$4 sm:$0xff]   ;;  %v1067_v49 = vld [vmem:[#allocation10 + $0x80] ss:$12 sps:$4 sm:$0xff]   ;;  %v1068_v51 = vld [vmem:[#allocation10 + $0x98] ss:$12 sps:$4 sm:$0xff]  }
  0x6c   :  { %288 = vmatprep.subr.bf16.mxu0 %v1018_v11  ;;  %929 = vmatprep.subr.bf16.mxu1 %v1267_v0  ;;  %v1069_v52 = vld [vmem:[#allocation10 + $0xb0] ss:$12 sps:$4 sm:$0xff]   ;;  %v1070_v53 = vld [vmem:[#allocation12] sm:$0xff]   ;;  %v1071_v54 = vld [vmem:[#allocation12 + $0x8] sm:$0xff]   ;;  %v138_v3 = vshrl.u32 %v137_v2, 7  ;;  %vm643_vm1 = vcmask 7168  }
  0x6d   :  { %v1072_v55 = vld [vmem:[#allocation12 + $0x10] sm:$0xff]   ;;  %v1073_v56 = vld [vmem:[#allocation12 + $0x18] sm:$0xff]   ;;  %v1074_v57 = vld [vmem:[#allocation12 + $0x20] sm:$0xff]   ;;  %645 = vst.msk [vmem:[#allocation3] sm:$0xff] %vm643_vm1, %v1267_v0 }
  0x6e   :  { %v1075_v58 = vld [vmem:[#allocation12 + $0x28] sm:$0xff]   ;;  %v1076_v59 = vld [vmem:[#allocation12 + $0x30] sm:$0xff]   ;;  %v1077_v60 = vld [vmem:[#allocation12 + $0x38] sm:$0xff]   ;;  %v139_v4 = vsub.s32 0, %v138_v3  ;;  %v143_v7 = vsub.s32 1, %v138_v3 }
  0x6f   :  { %289 = vmatpush1.bf16.msra.mxu0 %v1020_v13  ;;  %930 = vmatpush3.bf16.msra.mxu1 %v1040_v20  ;;  %v395_v5 = vld [vmem:[%s1471_s5] sm:$0x7] }
  0x70   :  { %290 = vmatprep.subr.bf16.mxu0 %v1021_v15  ;;  %931 = vmatprep.subr.bf16.mxu1 %v1267_v0  ;;  %v135_v6 = vld [vmem:[%s1470_s4] sm:$0x7]  ;;  %v400_v9 = vrot.slane %v395_v5, %v139_v4  ;;  %v404_v11 = vrot.slane %v395_v5, %v143_v7 }
  0x71   :  { %v140_v8 = vrot.slane %v135_v6, %v139_v4  ;;  %v144_v10 = vrot.slane %v135_v6, %v143_v7 }
  0x73   :  { %291 = vmatpush1.bf16.msra.mxu0 %v1023_v16  ;;  %932 = vmatpush3.bf16.msra.mxu1 %v1044_v23  ;;  %v981_v12 = vadd.f32 %v400_v9, %v140_v8  ;;  %v983_v14 = vadd.f32 %v404_v11, %v144_v10 }
  0x74   :  { %292 = vmatprep.subr.bf16.mxu0 %v1024_v18  ;;  %933 = vmatprep.subr.bf16.mxu1 %v1267_v0 }
  0x77   :  { %293 = vmatpush1.bf16.msra.mxu0 %v1027_v19  ;;  %934 = vmatpush3.bf16.msra.mxu1 %v1048_v27 }
  0x78   :  { %294 = vmatprep.subr.bf16.mxu0 %v1028_v21  ;;  %935 = vmatprep.subr.bf16.mxu1 %v1267_v0 }
  0x7b   :  { %295 = vmatpush1.bf16.msra.mxu0 %v1031_v22  ;;  %936 = vmatpush3.bf16.msra.mxu1 %v1052_v30 }
  0x7c   :  { %540 = vmatprep.subr.bf16.mxu0 %v1035_v24  ;;  %941 = vmatprep.subr.bf16.mxu1 %v1267_v0 }
  0x7e   :  { %313 = vmatmul.mubr.bf16.vlgmr.msra.gmra.mrb[0].mxu0 %v102_v26  ;;  %938 = vmatmul.mubr.bf16.vlgmr.msra.gmra.mrb[0].mxu1 %v102_v26 }
  0x7f   :  { %541 = vmatpush1.bf16.msra.mxu0 %v1033_v25  ;;  %572 = vmatprep.mubr.bf16.mxu0 %v1268_v1 }
  0x80   :  { %542 = vmatprep.subr.bf16.mxu0 %v1039_v28  ;;  %942 = vmatpush3.bf16.msra.mxu1 %v1059_v34  ;;  %v147_v28 = vsub.s32 2, %v138_v3 }
  0x81   :  { %943 = vmatprep.subr.bf16.mxu1 %v1267_v0  ;;  %957 = vmatprep.mubr.msk.bf16.mxu1 %vm1269_vm0, %v1267_v0 }
  0x83   :  { %543 = vmatpush1.bf16.msra.mxu0 %v1037_v29  ;;  %v408_v29 = vrot.slane %v395_v5, %v147_v28 }
  0x84   :  { %544 = vmatprep.subr.bf16.mxu0 %v1043_v31  ;;  %944 = vmatpush3.bf16.msra.mxu1 %v1063_v36  ;;  %v148_v31 = vrot.slane %v135_v6, %v147_v28 }
  0x85   :  { %945 = vmatprep.subr.bf16.mxu1 %v1267_v0 }
  0x87   :  { %545 = vmatpush1.bf16.msra.mxu0 %v1041_v32 }
  0x88   :  { %546 = vmatprep.subr.bf16.mxu0 %v1047_v33  ;;  %946 = vmatpush3.bf16.msra.mxu1 %v1064_v39 }
  0x89   :  { %947 = vmatprep.subr.bf16.mxu1 %v1267_v0 }
  0x8b   :  { %547 = vmatpush1.bf16.msra.mxu0 %v1045_v35 }
  0x8c   :  { %548 = vmatprep.subr.bf16.mxu0 %v1051_v37  ;;  %948 = vmatpush3.bf16.msra.mxu1 %v1065_v42 }
  0x8d   :  { %949 = vmatprep.subr.bf16.mxu1 %v1267_v0 }
  0x8f   :  { %549 = vmatpush1.bf16.msra.mxu0 %v1049_v38 }
  0x90   :  { %550 = vmatprep.subr.bf16.mxu0 %v1055_v40  ;;  %950 = vmatpush3.bf16.msra.mxu1 %v1066_v45  ;;  %v1270_v45 = vmov -inf  }
  0x91   :  { %951 = vmatprep.subr.bf16.mxu1 %v1267_v0  ;;  %644 = vst.msk [vmem:[#allocation2] sm:$0xff] %vm643_vm1, %v1270_v45 }
  0x93   :  { %551 = vmatpush1.bf16.msra.mxu0 %v1053_v41 }
  0x94   :  { %552 = vmatprep.subr.bf16.mxu0 %v1058_v43  ;;  %952 = vmatpush3.bf16.msra.mxu1 %v1067_v49 }
  0x95   :  { %953 = vmatprep.subr.bf16.mxu1 %v1267_v0 }
  0x97   :  { %553 = vmatpush1.bf16.msra.mxu0 %v1056_v44 }
  0x98   :  { %554 = vmatprep.subr.bf16.mxu0 %v1062_v46  ;;  %954 = vmatpush3.bf16.msra.mxu1 %v1068_v51  ;;  %v885_v46 = vld [vmem:[%s1473_s7] ss:$0 sm:$0xff]  ;;  %s1271_s7 = smov [#allocation14]  }
  0x99   :  { %955 = vmatprep.subr.bf16.mxu1 %v1267_v0  ;;  %s819_s29 = sshll.u32 %s1271_s7, 4  ;;  %s820_s29 = int_to_ptr.vmem [resolvable:$true] %s819_s29 }
  0x9a   :  { %s1204_s30 = scalar_lea.vmem %s820_s29, 128  ;;  %p1209_p13 = scmp.lt.s32.totalorder %s820_s29, %s820_s29 }
  0x9b   :  { %555 = vmatpush1.bf16.msra.mxu0 %v1060_v47  ;;  %p1205_p12 = scmp.ne.s32.totalorder %s820_s29, %s1204_s30  ;;  %p1210_p0 = scmp.lt.s32.totalorder %s1204_s30, %s1204_s30 }
  0x9c   :  { %961 = vmatprep.subr.bf16.mxu0 %v1267_v0  ;;  %956 = vmatpush3.bf16.msra.mxu1 %v1069_v52  ;;  %v764_v52 = vld [vmem:[#allocation2] sm:$0xff] }
  0x9d   :  { %p1211_p1 = por %p1210_p0, %p1209_p13 }
  0x9e   :  { %573 = vmatmul.mubr.bf16.vlgmr.msra.gmra.mrb[0].mxu0 %v362_v50 }
  0x9f   :  { %977 = vmatprep.mubr.msk.bf16.mxu0 %vm1269_vm0, %v1267_v0  ;;  %958 = vmatmul.mubr.bf16.vlgmr.msra.gmra.mrb[4].mxu1 %v362_v50  ;;  %p1212_p2 = pnand %p1211_p1, %p1205_p12 }
  0xa0   :  { %962 = vmatpush3.bf16.msra.mxu0 %v1070_v53 }
  0xa1   :  { %963 = vmatprep.subr.bf16.mxu0 %v1267_v0 }
  0xa4   :  { %964 = vmatpush3.bf16.msra.mxu0 %v1071_v54 }
  0xa5   :  { %965 = vmatprep.subr.bf16.mxu0 %v1267_v0 }
  0xa8   :  { %966 = vmatpush3.bf16.msra.mxu0 %v1072_v55 }
  0xa9   :  { %967 = vmatprep.subr.bf16.mxu0 %v1267_v0 }
  0xac   :  { %968 = vmatpush3.bf16.msra.mxu0 %v1073_v56 }
  0xad   :  { %969 = vmatprep.subr.bf16.mxu0 %v1267_v0 }
  0xb0   :  { %970 = vmatpush3.bf16.msra.mxu0 %v1074_v57 }
  0xb1   :  { %971 = vmatprep.subr.bf16.mxu0 %v1267_v0 }
  0xb4   :  { %972 = vmatpush3.bf16.msra.mxu0 %v1075_v58 }
  0xb5   :  { %973 = vmatprep.subr.bf16.mxu0 %v1267_v0 }
  0xb8   :  { %974 = vmatpush3.bf16.msra.mxu0 %v1076_v59 }
  0xb9   :  { %975 = vmatprep.subr.bf16.mxu0 %v1267_v0 }
  0xbc   :  { %976 = vmatpush3.bf16.msra.mxu0 %v1077_v60 }
 0x151   :  { %v355_v61 = vpop.f32.mrb[0].mxu1 }
 0x152   :  { %v939_v62 = vpop.f32.mrb[1].mxu1  ;;  %v356_v35 = vadd.f32 %v355_v61, %v148_v31  ;;  %v768_v61 = vld [vmem:[#allocation3] sm:$0xff] }
 0x153   :  { %v358_v63 = vpop.f32.mrb[2].mxu1 }
 0x154   :  { %v940_v1 = vpop.f32.mrb[3].mxu1 }
 0x171   :  { %v574_v13 = vpop.f32.mrb[0].mxu0 }
 0x172   :  { %v982_v15 = vadd.f32 %v981_v12, %v574_v13  ;;  %v576_v16 = vpop.f32.mrb[1].mxu0  ;;  %v615_v22 = vpop.f32.mrb[4].mxu1 }
 0x173   :  { %v578_v17 = vpop.f32.mrb[2].mxu0  ;;  %v984_v20 = vadd.f32 %v983_v14, %v576_v16  ;;  %v959_v23 = vpop.f32.mrb[5].mxu1  ;;  %v616_v33 = vadd.f32 %v615_v22, %v408_v29 }
 0x174   :  { %v883_v18 = vmul.f32 -1.442695, %v982_v15  ;;  %v579_v19 = vpop.f32.mrb[3].mxu0  ;;  %v618_v24 = vpop.f32.mrb[6].mxu1 }
 0x175   :  { %v884_v21 = vmul.f32 -1.442695, %v984_v20  ;;  %v960_v25 = vpop.f32.mrb[7].mxu1 }
 0x176   :  { %1078 = vpow2.f32 %v883_v18 }
 0x177   :  { %1080 = vpow2.f32 %v884_v21 }
 0x180   :  { %v1079_v26 = vpop.eup %1078 }
 0x181   :  { %v625_v27 = vadd.f32 1.0, %v1079_v26  ;;  %v1081_v30 = vpop.eup %1080 }
 0x182   :  { %v632_v32 = vadd.f32 1.0, %v1081_v30 }
 0x183   :  { %1082 = vrcp.f32 %v625_v27 }
 0x184   :  { %1084 = vrcp.f32 %v632_v32 }
 0x18d   :  { %v1083_v34 = vpop.eup %1082 }
 0x18e   :  { %v635_v36 = vmul.f32 %v1083_v34, %v616_v33  ;;  %v1085_v38 = vpop.eup %1084 }
 0x18f   :  { %v638_v39 = vsub.f32 1.0, %v1085_v38  ;;  %v640_v41 = vmul.f32 %v1085_v38, %v1410_v48 }
 0x190   :  { %v636_v37 = vadd.f32 %v635_v36, %v356_v35 }
 0x192   :  { %1086 = vtanh.f32 %v636_v37 }
 0x19c   :  { %v1087_v40 = vpop.eup %1086 }
 0x19d   :  { %v639_v42 = vmul.f32 %v1087_v40, %v638_v39 }
 0x19f   :  { %v641_v43 = vadd.f32 %v640_v41, %v639_v42 }
 0x1a1   :  { %642 = vst [vmem:[#allocation14] sm:$0xff] %v641_v43  ;;  %v647_v44 = vpack.c.bf16 %v641_v43, %v641_v43 }
 0x1a3   :  { %978 = vmatmul.mubr.bf16.vlgmr.msra.gmra.mrb[4].mxu0 %v647_v44 }
 0x276   :  { %v753_v47 = vpop.f32.mrb[4].mxu0 }
 0x277   :  { %v754_v49 = vadd.f32 %v885_v46, %v753_v47  ;;  %v979_v50 = vpop.f32.mrb[5].mxu0 }
 0x278   :  { %v756_v48 = vpop.f32.mrb[6].mxu0 }
 0x279   :  { %765 = vmax.xlane.f32.xlu0 %v754_v49  ;;  %v980_v51 = vpop.f32.mrb[7].mxu0 }
 0x306   :  { %v766_v53 = vpop.xlane.xlu0 %765 }
 0x307   :  { %v767_v54 = vmax.f32 %v764_v52, %v766_v53 }
 0x309   :  { %v769_v55 = vsub.f32 %v764_v52, %v767_v54  ;;  %786 = vst.msk [vmem:[#allocation2] sm:$0xff] %vm643_vm1, %v767_v54  ;;  %775 = vperm.xlu0 %1004, %v767_v54  }
 0x30b   :  { %v770_v59 = vmul.f32 1.442695, %v769_v55 }
 0x310   :  { %v790_v5 = vld [vmem:[#allocation2] sm:$0xff] }
 0x388   :  { %v776_v56 = vpop.permute.xlu0 %775 }
 0x389   :  { %v778_v57 = vsub.f32 %v754_v49, %v776_v56 }
 0x38b   :  { %v779_v0 = vmul.f32 1.442695, %v778_v57 }
 0x38d   :  { %1088 = vpow2.f32 %v779_v0 }
 0x38e   :  { %1090 = vpow2.f32 %v770_v59 }
 0x397   :  { %v1089_v58 = vpop.eup %1088 }
 0x398   :  { %781 = vadd.xlane.f32.xlu1 %v1089_v58  ;;  %v1091_v60 = vpop.eup %1090 }
 0x399   :  { %v772_v62 = vmul.f32 %v1091_v60, %v768_v61 }
 0x425   :  { %v782_v63 = vpop.xlane.xlu1 %781 }
 0x426   :  { %v783_v1 = vadd.f32 %v782_v63, %v772_v62 }
 0x428   :  { %785 = vst.msk [vmem:[#allocation3] sm:$0xff] %vm643_vm1, %v783_v1 }
 0x42f   :  { %v791_v2 = vld [vmem:[#allocation3] sm:$0xff] }
 0x430   :  { %1092 = vlog2.f32 %v791_v2 }
 0x43a   :  { %v1093_v3 = vpop.eup %1092 }
 0x43b   :  { %v793_v4 = vmul.f32 0.6931472, %v1093_v3 }
 0x43d   :  { %v794_v6 = vadd.f32 %v793_v4, %v790_v5 }
 0x43f   :  { %798 = vperm.xlu1 %1005, %v794_v6  }
 0x440   :  { %1215 = shalt.err (!%p1212_p2)
}
 0x441   :  { %s1216_s13 = scalar_lea.hbm %s1475_s9, 128 }
 0x442   :  { %p1217_p3 = scmp.ne.s32.totalorder %s1475_s9, %s1216_s13  ;;  %p1220_p4 = scmp.lt.u32.totalorder %s1216_s13, %s1475_s9 }
 0x444   :  { %p1222_p5 = pnand %p1220_p4, %p1217_p3 }
 0x446   :  { %1225 = shalt.err (!%p1222_p5)
}
 0x447   :  { %822 = dma.vmem_to_hbm [thread:$0]  %s820_s29, 128, %s1475_s9, [#allocation15]  }
 0x448   :  { %s1272_s18 = smov [#allocation13]  }
 0x449   :  { %s809_s19 = sshll.u32 %s1272_s18, 4  ;;  %s810_s19 = int_to_ptr.vmem [resolvable:$true] %s809_s19 }
 0x44a   :  { %s1226_s20 = scalar_lea.vmem %s810_s19, 128  ;;  %p1231_p7 = scmp.lt.s32.totalorder %s810_s19, %s810_s19 }
 0x44b   :  { %p1227_p6 = scmp.ne.s32.totalorder %s810_s19, %s1226_s20  ;;  %p1232_p8 = scmp.lt.s32.totalorder %s1226_s20, %s1226_s20 }
 0x44d   :  { %p1233_p9 = por %p1232_p8, %p1231_p7 }
 0x44f   :  { %p1234_p10 = pnand %p1233_p9, %p1227_p6 }
 0x4be   :  { %v799_v7 = vpop.permute.xlu1 %798 }
 0x4bf   :  { %v801_v8 = vsub.f32 %v754_v49, %v799_v7 }
 0x4c1   :  { %802 = vst [vmem:[#allocation13] sm:$0xff] %v801_v8 }
 0x4c2   :  { %1237 = shalt.err (!%p1234_p10)
}
 0x4c3   :  { %s1238_s3 = scalar_lea.hbm %s1474_s8, 128 }
 0x4c4   :  { %p1239_p11 = scmp.ne.s32.totalorder %s1474_s8, %s1238_s3  ;;  %p1242_p12 = scmp.lt.u32.totalorder %s1238_s3, %s1474_s8 }
 0x4c6   :  { %p1244_p13 = pnand %p1242_p12, %p1239_p11 }
 0x4c8   :  { %1247 = shalt.err (!%p1244_p13)
}
 0x4c9   :  { %812 = dma.vmem_to_hbm [thread:$0]  %s810_s19, 128, %s1474_s8, [#allocation6]  }
 0x4ca   :  { %1254 = dma.done.wait [#allocation6], 128  }
 0x4cb   :  { %1255 = vsyncadd [#allocation6], 4294967168 }
 0x4cc   :  { %1256 = dma.done.wait [#allocation15], 128  }
 0x4cd   :  { %1257 = vsyncadd [#allocation15], 4294967168 }
 0x4ce   :  { %829 = vsyncpa [#allocation5], 1 }
 0x4cf   :  { %830 = vsyncpa [#allocation8], 1 }
 0x4d0   :  { %831 = vsyncpa [#allocation11], 1 }
 0x4d1   :  { %832 = vsyncpa [#allocation6], 1 }
 0x4d2   :  { %833 = vsyncpa [#allocation15], 1 }

// kernel: tpu_custom_call.1
= control target key start
LH: loop header
LB: loop body
LE: loop exit
PB: predicated region body
PF: predicated region fallthrough
CT: control target
= control target key end

     0   :  { %15 = vsyncpa [#allocation5], 0  ;;  %s1466_s0 = inlined_call_operand.hbm [shape: bf16[8,128], index: 0, kind: input, shape index: {}]   ;;  %s1467_s1 = inlined_call_operand.hbm [shape: f32[8,128], index: 1, kind: input, shape index: {}]   ;;  %s1468_s2 = inlined_call_operand.hbm [shape: bf16[128,384], index: 2, kind: input, shape index: {}]   ;;  %s1469_s3 = inlined_call_operand.hbm [shape: bf16[128,384], index: 3, kind: input, shape index: {}]   ;;  %s1470_s4 = inlined_call_operand.vmem [shape: f32[1,384], index: 4, kind: input, shape index: {}]   ;;  %s1471_s5 = inlined_call_operand.vmem [shape: f32[1,384], index: 5, kind: input, shape index: {}]   ;;  %s1472_s6 = inlined_call_operand.hbm [shape: bf16[128,128], index: 6, kind: input, shape index: {}]   ;;  %s1473_s7 = inlined_call_operand.vmem [shape: f32[1,128], index: 7, kind: input, shape index: {}]   ;;  %s1474_s8 = inlined_call_operand.hbm [shape: f32[8,128], index: 8, kind: output, shape index: {0}]   ;;  %s1475_s9 = inlined_call_operand.hbm [shape: f32[8,128], index: 9, kind: output, shape index: {1}]  }
   0x1   :  { %16 = vsyncpa [#allocation8], 0 }
   0x2   :  { %17 = vsyncpa [#allocation11], 0 }
   0x3   :  { %18 = vsyncpa [#allocation6], 0 }
   0x4   :  { %19 = vsyncpa [#allocation15], 0  ;;  %s1258_s30 = smov [#allocation7]   ;;  %s1094_s13 = scalar_lea.hbm %s1467_s1, 128 }
   0x5   :  { %s36_s10 = sshll.u32 %s1258_s30, 4  ;;  %p1095_p0 = scmp.ne.s32.totalorder %s1467_s1, %s1094_s13  ;;  %s37_s10 = int_to_ptr.vmem [resolvable:$true] %s36_s10 }
   0x6   :  { %p1098_p1 = scmp.lt.u32.totalorder %s1094_s13, %s1467_s1 }
   0x8   :  { %p1100_p2 = pnand %p1098_p1, %p1095_p0 }
   0xa   :  { %1103 = shalt.err (!%p1100_p2)
}
   0xb   :  { %s1104_s18 = scalar_lea.vmem %s37_s10, 128  ;;  %p1109_p4 = scmp.lt.s32.totalorder %s37_s10, %s37_s10 }
   0xc   :  { %p1105_p3 = scmp.ne.s32.totalorder %s37_s10, %s1104_s18  ;;  %p1110_p5 = scmp.lt.s32.totalorder %s1104_s18, %s1104_s18 }
   0xe   :  { %p1111_p6 = por %p1110_p5, %p1109_p4 }
  0x10   :  { %p1112_p7 = pnand %p1111_p6, %p1105_p3 }
  0x12   :  { %1115 = shalt.err (!%p1112_p7)
}
  0x13   :  { %39 = dma.hbm_to_vmem [thread:$0]  %s1467_s1, 128, %s37_s10, [#allocation8]  }
  0x14   :  { %s1259_s21 = smov [#allocation10]   ;;  %s1260_s23 = smov [#allocation4]  }
  0x15   :  { %s57_s22 = sshll.u32 %s1259_s21, 4  ;;  %s26_s24 = sshll.u32 %s1260_s23, 4  ;;  %s58_s22 = int_to_ptr.vmem [resolvable:$true] %s57_s22  ;;  %s27_s24 = int_to_ptr.vmem [resolvable:$true] %s26_s24 }
  0x16   :  { %s1116_s27 = scalar_lea.hbm %s1469_s3, 3072 }
  0x17   :  { %p1117_p8 = scmp.ne.s32.totalorder %s1469_s3, %s1116_s27  ;;  %p1120_p9 = scmp.lt.u32.totalorder %s1116_s27, %s1469_s3 }
  0x19   :  { %p1122_p10 = pnand %p1120_p9, %p1117_p8 }
  0x1b   :  { %1125 = shalt.err (!%p1122_p10)
}
  0x1c   :  { %s1126_s1 = scalar_lea.vmem %s58_s22, 3072  ;;  %p1131_p12 = scmp.lt.s32.totalorder %s58_s22, %s58_s22 }
  0x1d   :  { %p1127_p11 = scmp.ne.s32.totalorder %s58_s22, %s1126_s1  ;;  %p1132_p13 = scmp.lt.s32.totalorder %s1126_s1, %s1126_s1 }
  0x1f   :  { %p1133_p0 = por %p1132_p13, %p1131_p12 }
  0x21   :  { %p1134_p1 = pnand %p1133_p0, %p1127_p11 }
  0x23   :  { %1137 = shalt.err (!%p1134_p1)
}
  0x24   :  { %s1261_s10 = smov 192   ;;  %s1262_s12 = smov 12  }
  0x25   :  { %63 = dma.hbm_to_vmem [thread:$0]  %s1469_s3, 3072, %s58_s22, [#allocation11], %s1261_s10, %s1261_s10, %s1262_s12  }
  0x26   :  { %s1138_s17 = scalar_lea.hbm %s1466_s0, 64 }
  0x27   :  { %p1139_p2 = scmp.ne.s32.totalorder %s1466_s0, %s1138_s17  ;;  %p1142_p3 = scmp.lt.u32.totalorder %s1138_s17, %s1466_s0 }
  0x29   :  { %p1144_p4 = pnand %p1142_p3, %p1139_p2 }
  0x2b   :  { %1147 = shalt.err (!%p1144_p4)
}
  0x2c   :  { %s1148_s23 = scalar_lea.vmem %s27_s24, 64  ;;  %p1153_p6 = scmp.lt.s32.totalorder %s27_s24, %s27_s24 }
  0x2d   :  { %p1149_p5 = scmp.ne.s32.totalorder %s27_s24, %s1148_s23  ;;  %p1154_p7 = scmp.lt.s32.totalorder %s1148_s23, %s1148_s23 }
  0x2f   :  { %p1155_p8 = por %p1154_p7, %p1153_p6 }
  0x31   :  { %p1156_p9 = pnand %p1155_p8, %p1149_p5 }
  0x33   :  { %1159 = shalt.err (!%p1156_p9)
}
  0x34   :  { %29 = dma.hbm_to_vmem [thread:$0]  %s1466_s0, 64, %s27_s24, [#allocation5]  }
  0x35   :  { %s1263_s25 = smov [#allocation9]   ;;  %s1264_s27 = smov [#allocation12]  }
  0x36   :  { %s45_s26 = sshll.u32 %s1263_s25, 4  ;;  %s73_s28 = sshll.u32 %s1264_s27, 4  ;;  %s46_s26 = int_to_ptr.vmem [resolvable:$true] %s45_s26  ;;  %s74_s28 = int_to_ptr.vmem [resolvable:$true] %s73_s28 }
  0x37   :  { %s1160_s11 = scalar_lea.hbm %s1468_s2, 3072 }
  0x38   :  { %p1161_p10 = scmp.ne.s32.totalorder %s1468_s2, %s1160_s11  ;;  %p1164_p11 = scmp.lt.u32.totalorder %s1160_s11, %s1468_s2 }
  0x3a   :  { %p1166_p12 = pnand %p1164_p11, %p1161_p10 }
  0x3c   :  { %1169 = shalt.err (!%p1166_p12)
}
  0x3d   :  { %s1170_s0 = scalar_lea.vmem %s46_s26, 3072  ;;  %p1175_p0 = scmp.lt.s32.totalorder %s46_s26, %s46_s26 }
  0x3e   :  { %p1171_p13 = scmp.ne.s32.totalorder %s46_s26, %s1170_s0  ;;  %p1176_p1 = scmp.lt.s32.totalorder %s1170_s0, %s1170_s0 }
  0x40   :  { %p1177_p2 = por %p1176_p1, %p1175_p0 }
  0x42   :  { %p1178_p3 = pnand %p1177_p2, %p1171_p13 }
  0x44   :  { %1181 = shalt.err (!%p1178_p3)
}
  0x45   :  { %51 = dma.hbm_to_vmem [thread:$0]  %s1468_s2, 3072, %s46_s26, [#allocation8], %s1261_s10, %s1261_s10, %s1262_s12  }
  0x46   :  { %s1182_s19 = scalar_lea.hbm %s1472_s6, 1024 }
  0x47   :  { %p1183_p4 = scmp.ne.s32.totalorder %s1472_s6, %s1182_s19  ;;  %p1186_p5 = scmp.lt.u32.totalorder %s1182_s19, %s1472_s6 }
  0x49   :  { %p1188_p6 = pnand %p1186_p5, %p1183_p4 }
  0x4b   :  { %1191 = shalt.err (!%p1188_p6)
}
  0x4c   :  { %s1192_s22 = scalar_lea.vmem %s74_s28, 1024  ;;  %p1197_p8 = scmp.lt.s32.totalorder %s74_s28, %s74_s28 }
  0x4d   :  { %p1193_p7 = scmp.ne.s32.totalorder %s74_s28, %s1192_s22  ;;  %p1198_p9 = scmp.lt.s32.totalorder %s1192_s22, %s1192_s22 }
  0x4f   :  { %p1199_p10 = por %p1198_p9, %p1197_p8 }
  0x51   :  { %p1200_p11 = pnand %p1199_p10, %p1193_p7 }
  0x53   :  { %1203 = shalt.err (!%p1200_p11)
}
  0x54   :  { %s1265_s2 = smov 64   ;;  %s1266_s10 = smov 4  }
  0x55   :  { %79 = dma.hbm_to_vmem [thread:$0]  %s1472_s6, 1024, %s74_s28, [#allocation11], %s1265_s2, %s1265_s2, %s1266_s10  }
  0x56   :  { %1248 = dma.done.wait [#allocation5], 64  }
  0x57   :  { %1249 = vsyncadd [#allocation5], 4294967232 }
  0x58   :  { %1250 = dma.done.wait [#allocation8], 3200  }
  0x59   :  { %1251 = vsyncadd [#allocation8], 4294964096 }
  0x5a   :  { %1252 = dma.done.wait [#allocation11], 4096  }
  0x5b   :  { %1253 = vsyncadd [#allocation11], 4294963200  ;;  %v1267_v0 = vmov 0.0   ;;  %v1268_v1 = vmov 0   ;;  %vm1269_vm0 = vmmov 0   ;;  %v1410_v48 = vld [vmem:[#allocation7] sm:$0xff] }
  0x5c   :  { %921 = vmatprep.subr.bf16.mxu1 %v1267_v0  ;;  %312 = vmatprep.mubr.bf16.mxu0 %v1268_v1  ;;  %v1006_v2 = vld [vmem:[#allocation9 + $0x4] ss:$12 sps:$4 sm:$0xff]   ;;  %v1008_v3 = vld [vmem:[#allocation9] ss:$12 sps:$4 sm:$0xff]   ;;  %v1009_v4 = vld [vmem:[#allocation9 + $0x1c] ss:$12 sps:$4 sm:$0xff]   ;;  %v362_v50 = vpack.c.bf16 %v1410_v48, %v1410_v48 }
  0x5d   :  { %937 = vmatprep.mubr.msk.bf16.mxu1 %vm1269_vm0, %v1267_v0  ;;  %1004 = vset.pattern.permute.xlu0 %v1268_v1  ;;  %v1011_v5 = vld [vmem:[#allocation9 + $0x18] ss:$12 sps:$4 sm:$0xff]   ;;  %v1012_v6 = vld [vmem:[#allocation9 + $0x34] ss:$12 sps:$4 sm:$0xff]   ;;  %v1014_v7 = vld [vmem:[#allocation9 + $0x30] ss:$12 sps:$4 sm:$0xff]  }
  0x5e   :  { %1005 = vset.pattern.permute.xlu1 %v1268_v1  ;;  %280 = vmatprep.subr.bf16.mxu0 %v1006_v2  ;;  %v1015_v8 = vld [vmem:[#allocation9 + $0x4c] ss:$12 sps:$4 sm:$0xff]   ;;  %v1026_v9 = vld [vmem:[#allocation9 + $0x8] ss:$12 sps:$4 sm:$0xff]   ;;  %v1018_v11 = vld [vmem:[#allocation9 + $0x64] ss:$12 sps:$4 sm:$0xff]   ;;  %v137_v2 = vlaneseq }
  0x5f   :  { %281 = vmatpush1.bf16.msra.mxu0 %v1008_v3  ;;  %v1017_v10 = vld [vmem:[#allocation9 + $0x48] ss:$12 sps:$4 sm:$0xff]   ;;  %922 = vmatpush3.bf16.msra.mxu1 %v1026_v9  ;;  %v1030_v12 = vld [vmem:[#allocation9 + $0x20] ss:$12 sps:$4 sm:$0xff]   ;;  %v1032_v14 = vld [vmem:[#allocation9 + $0x38] ss:$12 sps:$4 sm:$0xff]  }
  0x60   :  { %282 = vmatprep.subr.bf16.mxu0 %v1009_v4  ;;  %923 = vmatprep.subr.bf16.mxu1 %v1267_v0  ;;  %v1020_v13 = vld [vmem:[#allocation9 + $0x60] ss:$12 sps:$4 sm:$0xff]   ;;  %v1021_v15 = vld [vmem:[#allocation9 + $0x7c] ss:$12 sps:$4 sm:$0xff]   ;;  %v1023_v16 = vld [vmem:[#allocation9 + $0x78] ss:$12 sps:$4 sm:$0xff]  }
  0x61   :  { %v1036_v17 = vld [vmem:[#allocation9 + $0x50] ss:$12 sps:$4 sm:$0xff]   ;;  %v1024_v18 = vld [vmem:[#allocation9 + $0x94] ss:$12 sps:$4 sm:$0xff]   ;;  %v1028_v21 = vld [vmem:[#allocation9 + $0xac] ss:$12 sps:$4 sm:$0xff]  }
  0x62   :  { %v1027_v19 = vld [vmem:[#allocation9 + $0x90] ss:$12 sps:$4 sm:$0xff]   ;;  %v1040_v20 = vld [vmem:[#allocation9 + $0x68] ss:$12 sps:$4 sm:$0xff]   ;;  %v1044_v23 = vld [vmem:[#allocation9 + $0x80] ss:$12 sps:$4 sm:$0xff]  }
  0x63   :  { %283 = vmatpush1.bf16.msra.mxu0 %v1011_v5  ;;  %924 = vmatpush3.bf16.msra.mxu1 %v1030_v12  ;;  %v1031_v22 = vld [vmem:[#allocation9 + $0xa8] ss:$12 sps:$4 sm:$0xff]   ;;  %v1035_v24 = vld [vmem:[#allocation10 + $0x4] ss:$12 sps:$4 sm:$0xff]   ;;  %v1033_v25 = vld [vmem:[#allocation10] ss:$12 sps:$4 sm:$0xff]  }
  0x64   :  { %284 = vmatprep.subr.bf16.mxu0 %v1012_v6  ;;  %925 = vmatprep.subr.bf16.mxu1 %v1267_v0  ;;  %v102_v26 = vld [vmem:[#allocation4] sm:$0xf]  ;;  %v1048_v27 = vld [vmem:[#allocation9 + $0x98] ss:$12 sps:$4 sm:$0xff]   ;;  %v1039_v28 = vld [vmem:[#allocation10 + $0x1c] ss:$12 sps:$4 sm:$0xff]  }
  0x65   :  { %v1037_v29 = vld [vmem:[#allocation10 + $0x18] ss:$12 sps:$4 sm:$0xff]   ;;  %v1052_v30 = vld [vmem:[#allocation9 + $0xb0] ss:$12 sps:$4 sm:$0xff]   ;;  %v1043_v31 = vld [vmem:[#allocation10 + $0x34] ss:$12 sps:$4 sm:$0xff]  }
  0x66   :  { %v1041_v32 = vld [vmem:[#allocation10 + $0x30] ss:$12 sps:$4 sm:$0xff]   ;;  %v1047_v33 = vld [vmem:[#allocation10 + $0x4c] ss:$12 sps:$4 sm:$0xff]   ;;  %v1059_v34 = vld [vmem:[#allocation10 + $0x8] ss:$12 sps:$4 sm:$0xff]  }
  0x67   :  { %285 = vmatpush1.bf16.msra.mxu0 %v1014_v7  ;;  %926 = vmatpush3.bf16.msra.mxu1 %v1032_v14  ;;  %v1045_v35 = vld [vmem:[#allocation10 + $0x48] ss:$12 sps:$4 sm:$0xff]   ;;  %v1063_v36 = vld [vmem:[#allocation10 + $0x20] ss:$12 sps:$4 sm:$0xff]   ;;  %v1051_v37 = vld [vmem:[#allocation10 + $0x64] ss:$12 sps:$4 sm:$0xff]  }
  0x68   :  { %286 = vmatprep.subr.bf16.mxu0 %v1015_v8  ;;  %927 = vmatprep.subr.bf16.mxu1 %v1267_v0  ;;  %v1049_v38 = vld [vmem:[#allocation10 + $0x60] ss:$12 sps:$4 sm:$0xff]   ;;  %v1064_v39 = vld [vmem:[#allocation10 + $0x38] ss:$12 sps:$4 sm:$0xff]   ;;  %v1055_v40 = vld [vmem:[#allocation10 + $0x7c] ss:$12 sps:$4 sm:$0xff]  }
  0x69   :  { %v1053_v41 = vld [vmem:[#allocation10 + $0x78] ss:$12 sps:$4 sm:$0xff]   ;;  %v1065_v42 = vld [vmem:[#allocation10 + $0x50] ss:$12 sps:$4 sm:$0xff]   ;;  %v1058_v43 = vld [vmem:[#allocation10 + $0x94] ss:$12 sps:$4 sm:$0xff]  }
  0x6a   :  { %v1056_v44 = vld [vmem:[#allocation10 + $0x90] ss:$12 sps:$4 sm:$0xff]   ;;  %v1066_v45 = vld [vmem:[#allocation10 + $0x68] ss:$12 sps:$4 sm:$0xff]   ;;  %v1062_v46 = vld [vmem:[#allocation10 + $0xac] ss:$12 sps:$4 sm:$0xff]  }
  0x6b   :  { %287 = vmatpush1.bf16.msra.mxu0 %v1017_v10  ;;  %928 = vmatpush3.bf16.msra.mxu1 %v1036_v17  ;;  %v1060_v47 = vld [vmem:[#allocation10 + $0xa8] ss:$12 sps:$4 sm:$0xff]   ;;  %v1067_v49 = vld [vmem:[#allocation10 + $0x80] ss:$12 sps:$4 sm:$0xff]   ;;  %v1068_v51 = vld [vmem:[#allocation10 + $0x98] ss:$12 sps:$4 sm:$0xff]  }
  0x6c   :  { %288 = vmatprep.subr.bf16.mxu0 %v1018_v11  ;;  %929 = vmatprep.subr.bf16.mxu1 %v1267_v0  ;;  %v1069_v52 = vld [vmem:[#allocation10 + $0xb0] ss:$12 sps:$4 sm:$0xff]   ;;  %v1070_v53 = vld [vmem:[#allocation12] sm:$0xff]   ;;  %v1071_v54 = vld [vmem:[#allocation12 + $0x8] sm:$0xff]   ;;  %v138_v3 = vshrl.u32 %v137_v2, 7  ;;  %vm643_vm1 = vcmask 7168  }
  0x6d   :  { %v1072_v55 = vld [vmem:[#allocation12 + $0x10] sm:$0xff]   ;;  %v1073_v56 = vld [vmem:[#allocation12 + $0x18] sm:$0xff]   ;;  %v1074_v57 = vld [vmem:[#allocation12 + $0x20] sm:$0xff]   ;;  %645 = vst.msk [vmem:[#allocation3] sm:$0xff] %vm643_vm1, %v1267_v0 }
  0x6e   :  { %v1075_v58 = vld [vmem:[#allocation12 + $0x28] sm:$0xff]   ;;  %v1076_v59 = vld [vmem:[#allocation12 + $0x30] sm:$0xff]   ;;  %v1077_v60 = vld [vmem:[#allocation12 + $0x38] sm:$0xff]   ;;  %v139_v4 = vsub.s32 0, %v138_v3  ;;  %v143_v7 = vsub.s32 1, %v138_v3 }
  0x6f   :  { %289 = vmatpush1.bf16.msra.mxu0 %v1020_v13  ;;  %930 = vmatpush3.bf16.msra.mxu1 %v1040_v20  ;;  %v395_v5 = vld [vmem:[%s1471_s5] sm:$0x7] }
  0x70   :  { %290 = vmatprep.subr.bf16.mxu0 %v1021_v15  ;;  %931 = vmatprep.subr.bf16.mxu1 %v1267_v0  ;;  %v135_v6 = vld [vmem:[%s1470_s4] sm:$0x7]  ;;  %v400_v9 = vrot.slane %v395_v5, %v139_v4  ;;  %v404_v11 = vrot.slane %v395_v5, %v143_v7 }
  0x71   :  { %v140_v8 = vrot.slane %v135_v6, %v139_v4  ;;  %v144_v10 = vrot.slane %v135_v6, %v143_v7 }
  0x73   :  { %291 = vmatpush1.bf16.msra.mxu0 %v1023_v16  ;;  %932 = vmatpush3.bf16.msra.mxu1 %v1044_v23  ;;  %v981_v12 = vadd.f32 %v400_v9, %v140_v8  ;;  %v983_v14 = vadd.f32 %v404_v11, %v144_v10 }
  0x74   :  { %292 = vmatprep.subr.bf16.mxu0 %v1024_v18  ;;  %933 = vmatprep.subr.bf16.mxu1 %v1267_v0 }
  0x77   :  { %293 = vmatpush1.bf16.msra.mxu0 %v1027_v19  ;;  %934 = vmatpush3.bf16.msra.mxu1 %v1048_v27 }
  0x78   :  { %294 = vmatprep.subr.bf16.mxu0 %v1028_v21  ;;  %935 = vmatprep.subr.bf16.mxu1 %v1267_v0 }
  0x7b   :  { %295 = vmatpush1.bf16.msra.mxu0 %v1031_v22  ;;  %936 = vmatpush3.bf16.msra.mxu1 %v1052_v30 }
  0x7c   :  { %540 = vmatprep.subr.bf16.mxu0 %v1035_v24  ;;  %941 = vmatprep.subr.bf16.mxu1 %v1267_v0 }
  0x7e   :  { %313 = vmatmul.mubr.bf16.vlgmr.msra.gmra.mrb[0].mxu0 %v102_v26  ;;  %938 = vmatmul.mubr.bf16.vlgmr.msra.gmra.mrb[0].mxu1 %v102_v26 }
  0x7f   :  { %541 = vmatpush1.bf16.msra.mxu0 %v1033_v25  ;;  %572 = vmatprep.mubr.bf16.mxu0 %v1268_v1 }
  0x80   :  { %542 = vmatprep.subr.bf16.mxu0 %v1039_v28  ;;  %942 = vmatpush3.bf16.msra.mxu1 %v1059_v34  ;;  %v147_v28 = vsub.s32 2, %v138_v3 }
  0x81   :  { %943 = vmatprep.subr.bf16.mxu1 %v1267_v0  ;;  %957 = vmatprep.mubr.msk.bf16.mxu1 %vm1269_vm0, %v1267_v0 }
  0x83   :  { %543 = vmatpush1.bf16.msra.mxu0 %v1037_v29  ;;  %v408_v29 = vrot.slane %v395_v5, %v147_v28 }
  0x84   :  { %544 = vmatprep.subr.bf16.mxu0 %v1043_v31  ;;  %944 = vmatpush3.bf16.msra.mxu1 %v1063_v36  ;;  %v148_v31 = vrot.slane %v135_v6, %v147_v28 }
  0x85   :  { %945 = vmatprep.subr.bf16.mxu1 %v1267_v0 }
  0x87   :  { %545 = vmatpush1.bf16.msra.mxu0 %v1041_v32 }
  0x88   :  { %546 = vmatprep.subr.bf16.mxu0 %v1047_v33  ;;  %946 = vmatpush3.bf16.msra.mxu1 %v1064_v39 }
  0x89   :  { %947 = vmatprep.subr.bf16.mxu1 %v1267_v0 }
  0x8b   :  { %547 = vmatpush1.bf16.msra.mxu0 %v1045_v35 }
  0x8c   :  { %548 = vmatprep.subr.bf16.mxu0 %v1051_v37  ;;  %948 = vmatpush3.bf16.msra.mxu1 %v1065_v42 }
  0x8d   :  { %949 = vmatprep.subr.bf16.mxu1 %v1267_v0 }
  0x8f   :  { %549 = vmatpush1.bf16.msra.mxu0 %v1049_v38 }
  0x90   :  { %550 = vmatprep.subr.bf16.mxu0 %v1055_v40  ;;  %950 = vmatpush3.bf16.msra.mxu1 %v1066_v45  ;;  %v1270_v45 = vmov -inf  }
  0x91   :  { %951 = vmatprep.subr.bf16.mxu1 %v1267_v0  ;;  %644 = vst.msk [vmem:[#allocation2] sm:$0xff] %vm643_vm1, %v1270_v45 }
  0x93   :  { %551 = vmatpush1.bf16.msra.mxu0 %v1053_v41 }
  0x94   :  { %552 = vmatprep.subr.bf16.mxu0 %v1058_v43  ;;  %952 = vmatpush3.bf16.msra.mxu1 %v1067_v49 }
  0x95   :  { %953 = vmatprep.subr.bf16.mxu1 %v1267_v0 }
  0x97   :  { %553 = vmatpush1.bf16.msra.mxu0 %v1056_v44 }
  0x98   :  { %554 = vmatprep.subr.bf16.mxu0 %v1062_v46  ;;  %954 = vmatpush3.bf16.msra.mxu1 %v1068_v51  ;;  %v885_v46 = vld [vmem:[%s1473_s7] ss:$0 sm:$0xff]  ;;  %s1271_s7 = smov [#allocation14]  }
  0x99   :  { %955 = vmatprep.subr.bf16.mxu1 %v1267_v0  ;;  %s819_s29 = sshll.u32 %s1271_s7, 4  ;;  %s820_s29 = int_to_ptr.vmem [resolvable:$true] %s819_s29 }
  0x9a   :  { %s1204_s30 = scalar_lea.vmem %s820_s29, 128  ;;  %p1209_p13 = scmp.lt.s32.totalorder %s820_s29, %s820_s29 }
  0x9b   :  { %555 = vmatpush1.bf16.msra.mxu0 %v1060_v47  ;;  %p1205_p12 = scmp.ne.s32.totalorder %s820_s29, %s1204_s30  ;;  %p1210_p0 = scmp.lt.s32.totalorder %s1204_s30, %s1204_s30 }
  0x9c   :  { %961 = vmatprep.subr.bf16.mxu0 %v1267_v0  ;;  %956 = vmatpush3.bf16.msra.mxu1 %v1069_v52  ;;  %v764_v52 = vld [vmem:[#allocation2] sm:$0xff] }
  0x9d   :  { %p1211_p1 = por %p1210_p0, %p1209_p13 }
  0x9e   :  { %573 = vmatmul.mubr.bf16.vlgmr.msra.gmra.mrb[0].mxu0 %v362_v50 }
  0x9f   :  { %977 = vmatprep.mubr.msk.bf16.mxu0 %vm1269_vm0, %v1267_v0  ;;  %958 = vmatmul.mubr.bf16.vlgmr.msra.gmra.mrb[4].mxu1 %v362_v50  ;;  %p1212_p2 = pnand %p1211_p1, %p1205_p12 }
  0xa0   :  { %962 = vmatpush3.bf16.msra.mxu0 %v1070_v53 }
  0xa1   :  { %963 = vmatprep.subr.bf16.mxu0 %v1267_v0 }
  0xa4   :  { %964 = vmatpush3.bf16.msra.mxu0 %v1071_v54 }
  0xa5   :  { %965 = vmatprep.subr.bf16.mxu0 %v1267_v0 }
  0xa8   :  { %966 = vmatpush3.bf16.msra.mxu0 %v1072_v55 }
  0xa9   :  { %967 = vmatprep.subr.bf16.mxu0 %v1267_v0 }
  0xac   :  { %968 = vmatpush3.bf16.msra.mxu0 %v1073_v56 }
  0xad   :  { %969 = vmatprep.subr.bf16.mxu0 %v1267_v0 }
  0xb0   :  { %970 = vmatpush3.bf16.msra.mxu0 %v1074_v57 }
  0xb1   :  { %971 = vmatprep.subr.bf16.mxu0 %v1267_v0 }
  0xb4   :  { %972 = vmatpush3.bf16.msra.mxu0 %v1075_v58 }
  0xb5   :  { %973 = vmatprep.subr.bf16.mxu0 %v1267_v0 }
  0xb8   :  { %974 = vmatpush3.bf16.msra.mxu0 %v1076_v59 }
  0xb9   :  { %975 = vmatprep.subr.bf16.mxu0 %v1267_v0 }
  0xbc   :  { %976 = vmatpush3.bf16.msra.mxu0 %v1077_v60 }
 0x151   :  { %v355_v61 = vpop.f32.mrb[0].mxu1 }
 0x152   :  { %v939_v62 = vpop.f32.mrb[1].mxu1  ;;  %v356_v35 = vadd.f32 %v355_v61, %v148_v31  ;;  %v768_v61 = vld [vmem:[#allocation3] sm:$0xff] }
 0x153   :  { %v358_v63 = vpop.f32.mrb[2].mxu1 }
 0x154   :  { %v940_v1 = vpop.f32.mrb[3].mxu1 }
 0x171   :  { %v574_v13 = vpop.f32.mrb[0].mxu0 }
 0x172   :  { %v982_v15 = vadd.f32 %v981_v12, %v574_v13  ;;  %v576_v16 = vpop.f32.mrb[1].mxu0  ;;  %v615_v22 = vpop.f32.mrb[4].mxu1 }
 0x173   :  { %v578_v17 = vpop.f32.mrb[2].mxu0  ;;  %v984_v20 = vadd.f32 %v983_v14, %v576_v16  ;;  %v959_v23 = vpop.f32.mrb[5].mxu1  ;;  %v616_v33 = vadd.f32 %v615_v22, %v408_v29 }
 0x174   :  { %v883_v18 = vmul.f32 -1.442695, %v982_v15  ;;  %v579_v19 = vpop.f32.mrb[3].mxu0  ;;  %v618_v24 = vpop.f32.mrb[6].mxu1 }
 0x175   :  { %v884_v21 = vmul.f32 -1.442695, %v984_v20  ;;  %v960_v25 = vpop.f32.mrb[7].mxu1 }
 0x176   :  { %1078 = vpow2.f32 %v883_v18 }
 0x177   :  { %1080 = vpow2.f32 %v884_v21 }
 0x180   :  { %v1079_v26 = vpop.eup %1078 }
 0x181   :  { %v625_v27 = vadd.f32 1.0, %v1079_v26  ;;  %v1081_v30 = vpop.eup %1080 }
 0x182   :  { %v632_v32 = vadd.f32 1.0, %v1081_v30 }
 0x183   :  { %1082 = vrcp.f32 %v625_v27 }
 0x184   :  { %1084 = vrcp.f32 %v632_v32 }
 0x18d   :  { %v1083_v34 = vpop.eup %1082 }
 0x18e   :  { %v635_v36 = vmul.f32 %v1083_v34, %v616_v33  ;;  %v1085_v38 = vpop.eup %1084 }
 0x18f   :  { %v638_v39 = vsub.f32 1.0, %v1085_v38  ;;  %v640_v41 = vmul.f32 %v1085_v38, %v1410_v48 }
 0x190   :  { %v636_v37 = vadd.f32 %v635_v36, %v356_v35 }
 0x192   :  { %1086 = vtanh.f32 %v636_v37 }
 0x19c   :  { %v1087_v40 = vpop.eup %1086 }
 0x19d   :  { %v639_v42 = vmul.f32 %v1087_v40, %v638_v39 }
 0x19f   :  { %v641_v43 = vadd.f32 %v640_v41, %v639_v42 }
 0x1a1   :  { %642 = vst [vmem:[#allocation14] sm:$0xff] %v641_v43  ;;  %v647_v44 = vpack.c.bf16 %v641_v43, %v641_v43 }
 0x1a3   :  { %978 = vmatmul.mubr.bf16.vlgmr.msra.gmra.mrb[4].mxu0 %v647_v44 }
 0x276   :  { %v753_v47 = vpop.f32.mrb[4].mxu0 }
 0x277   :  { %v754_v49 = vadd.f32 %v885_v46, %v753_v47  ;;  %v979_v50 = vpop.f32.mrb[5].mxu0 }
 0x278   :  { %v756_v48 = vpop.f32.mrb[6].mxu0 }
 0x279   :  { %765 = vmax.xlane.f32.xlu0 %v754_v49  ;;  %v980_v51 = vpop.f32.mrb[7].mxu0 }
 0x306   :  { %v766_v53 = vpop.xlane.xlu0 %765 }
 0x307   :  { %v767_v54 = vmax.f32 %v764_v52, %v766_v53 }
 0x309   :  { %v769_v55 = vsub.f32 %v764_v52, %v767_v54  ;;  %786 = vst.msk [vmem:[#allocation2] sm:$0xff] %vm643_vm1, %v767_v54  ;;  %775 = vperm.xlu0 %1004, %v767_v54  }
 0x30b   :  { %v770_v59 = vmul.f32 1.442695, %v769_v55 }
 0x310   :  { %v790_v5 = vld [vmem:[#allocation2] sm:$0xff] }
 0x388   :  { %v776_v56 = vpop.permute.xlu0 %775 }
 0x389   :  { %v778_v57 = vsub.f32 %v754_v49, %v776_v56 }
 0x38b   :  { %v779_v0 = vmul.f32 1.442695, %v778_v57 }
 0x38d   :  { %1088 = vpow2.f32 %v779_v0 }
 0x38e   :  { %1090 = vpow2.f32 %v770_v59 }
 0x397   :  { %v1089_v58 = vpop.eup %1088 }
 0x398   :  { %781 = vadd.xlane.f32.xlu1 %v1089_v58  ;;  %v1091_v60 = vpop.eup %1090 }
 0x399   :  { %v772_v62 = vmul.f32 %v1091_v60, %v768_v61 }
 0x425   :  { %v782_v63 = vpop.xlane.xlu1 %781 }
 0x426   :  { %v783_v1 = vadd.f32 %v782_v63, %v772_v62 }
 0x428   :  { %785 = vst.msk [vmem:[#allocation3] sm:$0xff] %vm643_vm1, %v783_v1 }
 0x42f   :  { %v791_v2 = vld [vmem:[#allocation3] sm:$0xff] }
 0x430   :  { %1092 = vlog2.f32 %v791_v2 }
 0x43a   :  { %v1093_v3 = vpop.eup %1092 }
 0x43b   :  { %v793_v4 = vmul.f32 0.6931472, %v1093_v3 }
 0x43d   :  { %v794_v6 = vadd.f32 %v793_v4, %v790_v5 }
 0x43f   :  { %798 = vperm.xlu1 %1005, %v794_v6  }
 0x440   :  { %1215 = shalt.err (!%p1212_p2)
}
 0x441   :  { %s1216_s13 = scalar_lea.hbm %s1475_s9, 128 }
 0x442   :  { %p1217_p3 = scmp.ne.s32.totalorder %s1475_s9, %s1216_s13  ;;  %p1220_p4 = scmp.lt.u32.totalorder %s1216_s13, %s1475_s9 }
 0x444   :  { %p1222_p5 = pnand %p1220_p4, %p1217_p3 }
 0x446   :  { %1225 = shalt.err (!%p1222_p5)
}
 0x447   :  { %822 = dma.vmem_to_hbm [thread:$0]  %s820_s29, 128, %s1475_s9, [#allocation15]  }
 0x448   :  { %s1272_s18 = smov [#allocation13]  }
 0x449   :  { %s809_s19 = sshll.u32 %s1272_s18, 4  ;;  %s810_s19 = int_to_ptr.vmem [resolvable:$true] %s809_s19 }
 0x44a   :  { %s1226_s20 = scalar_lea.vmem %s810_s19, 128  ;;  %p1231_p7 = scmp.lt.s32.totalorder %s810_s19, %s810_s19 }
 0x44b   :  { %p1227_p6 = scmp.ne.s32.totalorder %s810_s19, %s1226_s20  ;;  %p1232_p8 = scmp.lt.s32.totalorder %s1226_s20, %s1226_s20 }
 0x44d   :  { %p1233_p9 = por %p1232_p8, %p1231_p7 }
 0x44f   :  { %p1234_p10 = pnand %p1233_p9, %p1227_p6 }
 0x4be   :  { %v799_v7 = vpop.permute.xlu1 %798 }
 0x4bf   :  { %v801_v8 = vsub.f32 %v754_v49, %v799_v7 }
 0x4c1   :  { %802 = vst [vmem:[#allocation13] sm:$0xff] %v801_v8 }
 0x4c2   :  { %1237 = shalt.err (!%p1234_p10)
}
 0x4c3   :  { %s1238_s3 = scalar_lea.hbm %s1474_s8, 128 }
 0x4c4   :  { %p1239_p11 = scmp.ne.s32.totalorder %s1474_s8, %s1238_s3  ;;  %p1242_p12 = scmp.lt.u32.totalorder %s1238_s3, %s1474_s8 }
 0x4c6   :  { %p1244_p13 = pnand %p1242_p12, %p1239_p11 }
 0x4c8   :  { %1247 = shalt.err (!%p1244_p13)
}
 0x4c9   :  { %812 = dma.vmem_to_hbm [thread:$0]  %s810_s19, 128, %s1474_s8, [#allocation6]  }
 0x4ca   :  { %1254 = dma.done.wait [#allocation6], 128  }
 0x4cb   :  { %1255 = vsyncadd [#allocation6], 4294967168 }
 0x4cc   :  { %1256 = dma.done.wait [#allocation15], 128  }
 0x4cd   :  { %1257 = vsyncadd [#allocation15], 4294967168 }
 0x4ce   :  { %829 = vsyncpa [#allocation5], 1 }
 0x4cf   :  { %830 = vsyncpa [#allocation8], 1 }
 0x4d0   :  { %831 = vsyncpa [#allocation11], 1 }
 0x4d1   :  { %832 = vsyncpa [#allocation6], 1 }
 0x4d2   :  { %833 = vsyncpa [#allocation15], 1 }

</bundles_post_ra>
